<compile_context>
chip_gen: v7x
topology: tpu7x:2x2x1
jax: 0.10.0
libtpu: 0.0.40
codegen_flags: <defaults>
</compile_context>

<pallas_src>
import functools

import jax
import jax.numpy as jnp
from jax.experimental import pallas as pl
from jax.experimental.pallas import tpu as pltpu

_LANE = 128      # f32 lanes per vreg
_SUBLANE = 8     # f32 sublanes per vreg

# PyTorch gate order is (i, f, g, o); reorder to (i, f, o, g) so the three
# sigmoid gates form one contiguous lane-aligned slab and tanh(g) the other.
_GATE_PERM = (0, 1, 3, 2)


def _round_up(n, m):
    return ((n + m - 1) // m) * m


def _prep_gate_cols(w_t, H, Hp):
    """(rows, 4H) with gate-major columns -> (rows, 4*Hp): gates reordered to
    (i, f, o, g) and each gate block zero-padded from H to Hp columns."""
    rows = w_t.shape[0]
    w4 = w_t.reshape(rows, 4, H)
    w4 = jnp.take(w4, jnp.array(_GATE_PERM), axis=1)
    w4 = jnp.pad(w4, ((0, 0), (0, 0), (0, Hp - H)))
    return w4.reshape(rows, 4 * Hp)


def _lstm_recurrence_kernel(x_ref, wih_ref, whh_ref, b_ref, wfc_ref, bfc_ref,
                            out_ref, h_scr, c_scr, *,
                            hidden_pad, time_chunk, pad_first):
    """One grid step == `time_chunk` timesteps of one batch tile.

    x_ref  : (time_chunk, Bt, D)   time-major input chunk (weight dtype)
    wih_ref: (D, 4*Hp)             input->gate weights, gate order (i,f,o,g)
    whh_ref: (Hp, 4*Hp)            recurrent weights, gate order (i,f,o,g)
    b_ref  : (1, 4*Hp) f32         b_ih + b_hh
    wfc_ref: (Hp, Op)              FC head weights
    bfc_ref: (1, Op)  f32          FC head bias
    h_scr, c_scr : (Bt, Hp) f32    LSTM state, persists across time chunks

    NOTE: correctness of the h/c carry requires the time axis to be the LAST
    grid axis and marked "arbitrary" (each batch tile's chunks run in order
    on one core). Do not reorder the grid or mark time "parallel".
    """
    t_idx = pl.program_id(1)
    Hp = hidden_pad
    bt = h_scr.shape[0]

    @pl.when(t_idx == 0)
    def _():
        h_scr[...] = jnp.zeros_like(h_scr)
        c_scr[...] = jnp.zeros_like(c_scr)

    # Loads / broadcasts hoisted out of the unrolled time loop.
    w_ih = wih_ref[...]
    w_hh = whh_ref[...]
    bias = jnp.broadcast_to(b_ref[...], (bt, 4 * Hp))
    h = h_scr[...]
    c = c_scr[...]

    # Statically unrolled chunk: all slices are static, so the scheduler sees
    # the whole chunk and can overlap the h-independent projections with the
    # serial recurrence.
    # TODO(synk): hold W_hh resident on the MXU across timesteps with
    # pltpu.matmul_push_rhs / matmul_acc_lhs / matmul_pop once that explicit
    # path is validated; jnp.dot re-pushes the RHS each step.
    for i in range(time_chunk):
        gx = jnp.dot(x_ref[i], w_ih, preferred_element_type=jnp.float32) + bias
        if pad_first > 0 and i < pad_first:
            # Front-padded timesteps: zero pre-activation gates keep h=c=0
            # exactly, so padding T to a multiple of time_chunk is exact.
            gx = jnp.where(t_idx > 0, gx, 0.0)
        gates = gx + jnp.dot(h.astype(w_hh.dtype), w_hh,
                             preferred_element_type=jnp.float32)
        # sigmoid(x) = 0.5 + 0.5*tanh(0.5*x): one EUP op/elem (vs exp+recip),
        # applied to the contiguous (i, f, o) slab; cheap muls/adds go to VPU.
        sig = jnp.tanh(gates[:, :3 * Hp] * 0.5) * 0.5 + 0.5
        i_g = sig[:, 0 * Hp:1 * Hp]
        f_g = sig[:, 1 * Hp:2 * Hp]
        o_g = sig[:, 2 * Hp:3 * Hp]
        g_g = jnp.tanh(gates[:, 3 * Hp:4 * Hp])
        c = f_g * c + i_g * g_g
        h = o_g * jnp.tanh(c)

    h_scr[...] = h
    c_scr[...] = c

    # Final time chunk: FC head on the last hidden state (lane-dense Op store).
    @pl.when(t_idx == pl.num_programs(1) - 1)
    def _():
        out = (jnp.dot(h.astype(wfc_ref.dtype), wfc_ref[...],
                       preferred_element_type=jnp.float32) + bfc_ref[...])
        out_ref[...] = out.astype(out_ref.dtype)


def _vmem_capacity_bytes():
    try:
        cap = int(pltpu.get_tpu_info().vmem_capacity_bytes)
        if cap > 0:
            return cap
    except Exception:
        pass
    return 64 * 1024 * 1024   # conservative fallback (v7x per-core VMEM)


def _choose_tiles(B, T, D, Hp, Op, xbytes, wbytes, vmem_budget,
                  batch_tile=None, time_chunk=None):
    """VMEM-budget-driven (batch_tile, time_chunk) selection."""
    Bp8 = _round_up(max(B, 1), _SUBLANE)

    if batch_tile is None:
        batch_tile = min(Bp8, 128)
        # Guarantee >=2 batch tiles at moderate/large batch so the "parallel"
        # batch axis can actually shard across v7x's two TensorCores.
        if batch_tile == Bp8 and Bp8 >= 16:
            batch_tile = _round_up((Bp8 + 1) // 2, _SUBLANE)
    batch_tile = max(_SUBLANE, _round_up(batch_tile, _SUBLANE))

    def vmem_need(bt, tc):
        x_blk = 2 * tc * bt * D * xbytes                           # double-buffered x chunk
        weights = 2 * (D * 4 * Hp + Hp * 4 * Hp + Hp * Op) * wbytes
        biases = 2 * (4 * Hp + Op) * 4
        out_blk = 2 * bt * Op * 4
        state = 2 * bt * Hp * 4
        working = 6 * bt * 4 * Hp * 4                              # gate temporaries
        return x_blk + weights + biases + out_blk + state + working

    if time_chunk is None:
        time_chunk = 1
        for cand in (32, 16, 8, 4, 2, 1):
            tc = min(cand, max(T, 1))
            if vmem_need(batch_tile, tc) <= vmem_budget:
                time_chunk = tc
                break
    time_chunk = max(1, min(time_chunk, max(T, 1)))

    # If even the smallest chunk does not fit, shrink the batch tile.
    while vmem_need(batch_tile, time_chunk) > vmem_budget and batch_tile > _SUBLANE:
        batch_tile = max(_SUBLANE, _round_up(batch_tile // 2, _SUBLANE))

    Bp = _round_up(Bp8, batch_tile)
    return batch_tile, Bp, time_chunk, vmem_need(batch_tile, time_chunk)


def lstm_agent_forward(x, params, *, weight_dtype=jnp.bfloat16,
                       time_chunk=None, batch_tile=None):
    """x: (batch, seq, input_dim) float32; params: PyTorch-layout weights.

    weight_dtype=bfloat16 (default) uses the full-rate MXU path on every TPU
    generation; h/c state, gate math and matmul accumulation remain float32.
    Pass weight_dtype=jnp.float32 for bit-tight agreement with the reference.
    """
    B, T, D = x.shape
    w_ih = params["w_ih"]            # (4H, D)
    w_hh = params["w_hh"]            # (4H, H)
    b_ih = params["b_ih"]            # (4H,)
    b_hh = params["b_hh"]            # (4H,)
    w_fc = params["w_fc"]            # (O, H)
    b_fc = params["b_fc"]            # (O,)

    H = w_hh.shape[1]
    O = w_fc.shape[0]
    Hp = _round_up(H, _LANE)         # lane-aligned hidden dim
    Op = _round_up(O, _LANE)         # lane-dense output store

    xbytes = jnp.dtype(weight_dtype).itemsize
    wbytes = jnp.dtype(weight_dtype).itemsize

    vmem_cap = _vmem_capacity_bytes()
    vmem_budget = int(0.75 * vmem_cap)       # headroom for compiler scratch
    batch_tile, Bp, time_chunk, vmem_need = _choose_tiles(
        B, T, D, Hp, Op, xbytes, wbytes, vmem_budget,
        batch_tile=batch_tile, time_chunk=time_chunk)

    Tp = _round_up(max(T, 1), time_chunk)
    pad_first = Tp - T                       # exact zero-gate steps, prepended
    n_btiles = Bp // batch_tile
    n_tchunks = Tp // time_chunk

    # ---- weight layout glue (one-time, wrapper side) -----------------------
    w_ih_p = _prep_gate_cols(jnp.transpose(w_ih), H, Hp).astype(weight_dtype)     # (D, 4Hp)
    w_hh_p = _prep_gate_cols(jnp.transpose(w_hh), H, Hp)                           # (H, 4Hp)
    w_hh_p = jnp.pad(w_hh_p, ((0, Hp - H), (0, 0))).astype(weight_dtype)           # (Hp, 4Hp)
    bias_p = _prep_gate_cols((b_ih + b_hh).reshape(1, 4 * H), H, Hp)               # (1, 4Hp)
    bias_p = bias_p.astype(jnp.float32)
    w_fc_p = jnp.pad(jnp.transpose(w_fc),
                     ((0, Hp - H), (0, Op - O))).astype(weight_dtype)              # (Hp, Op)
    b_fc_p = jnp.pad(b_fc, (0, Op - O)).reshape(1, Op).astype(jnp.float32)

    # ---- input layout: time-major, batch padded, time front-padded ---------
    # Only x (not gates_x) crosses HBM: 4*Hp/D times less traffic than the
    # precomputed-gates scheme; the projection matmul runs inside the kernel.
    x_tm = jnp.transpose(x.astype(weight_dtype), (1, 0, 2))                        # (T, B, D)
    x_tm = jnp.pad(x_tm, ((pad_first, 0), (0, Bp - B), (0, 0)))                    # (Tp, Bp, D)

    kernel = functools.partial(_lstm_recurrence_kernel, hidden_pad=Hp,
                               time_chunk=time_chunk, pad_first=pad_first)

    # Advisory cost estimate so XLA schedules around the custom call sensibly.
    flops = int(2 * Tp * Bp * Hp * 4 * Hp          # recurrent matmuls
                + 2 * Tp * Bp * D * 4 * Hp         # fused input projection
                + 10 * Tp * Bp * Hp                # gate elementwise
                + 2 * Bp * Hp * Op)                # FC head
    transcendentals = int(5 * Tp * Bp * Hp)
    bytes_accessed = int(Tp * Bp * D * xbytes
                         + (D * 4 * Hp + Hp * 4 * Hp + Hp * Op) * wbytes
                         + (4 * Hp + Op) * 4 + Bp * Op * 4)

    vmem_limit = int(min(max(1.5 * vmem_need, 8 * 1024 * 1024), 0.9 * vmem_cap))

    out_padded = pl.pallas_call(
        kernel,
        out_shape=jax.ShapeDtypeStruct((Bp, Op), jnp.float32),
        grid_spec=pltpu.PrefetchScalarGridSpec(
            num_scalar_prefetch=0,
            # Batch tiles outer ("parallel", megacore-shardable); the serial
            # time axis LAST and "arbitrary" (state carry requirement).
            grid=(n_btiles, n_tchunks),
            in_specs=[
                pl.BlockSpec((time_chunk, batch_tile, D), lambda b, t: (t, b, 0)),
                pl.BlockSpec((D, 4 * Hp), lambda b, t: (0, 0)),
                pl.BlockSpec((Hp, 4 * Hp), lambda b, t: (0, 0)),
                pl.BlockSpec((1, 4 * Hp), lambda b, t: (0, 0)),
                pl.BlockSpec((Hp, Op), lambda b, t: (0, 0)),
                pl.BlockSpec((1, Op), lambda b, t: (0, 0)),
            ],
            out_specs=pl.BlockSpec((batch_tile, Op), lambda b, t: (b, 0)),
            scratch_shapes=[
                pltpu.VMEM((batch_tile, Hp), jnp.float32),   # h state
                pltpu.VMEM((batch_tile, Hp), jnp.float32),   # c state
            ],
        ),
        compiler_params=pltpu.CompilerParams(
            dimension_semantics=("parallel", "arbitrary"),
            vmem_limit_bytes=vmem_limit,
        ),
        cost_estimate=pl.CostEstimate(
            flops=flops,
            transcendentals=transcendentals,
            bytes_accessed=bytes_accessed,
        ),
    )(x_tm, w_ih_p, w_hh_p, bias_p, w_fc_p, b_fc_p)

    return out_padded[:B, :O]


def _reference_forward(x, params):
    """Pure-JAX reference matching PyTorch nn.LSTM + nn.Linear semantics."""
    B, T, D = x.shape
    H = params["w_hh"].shape[1]
    w_ih_t = params["w_ih"].T
    w_hh_t = params["w_hh"].T
    b = params["b_ih"] + params["b_hh"]

    h = jnp.zeros((B, H), jnp.float32)
    c = jnp.zeros((B, H), jnp.float32)
    for t in range(T):
        gates = x[:, t, :] @ w_ih_t + h @ w_hh_t + b
        i = jax.nn.sigmoid(gates[:, 0 * H:1 * H])
        f = jax.nn.sigmoid(gates[:, 1 * H:2 * H])
        g = jnp.tanh(gates[:, 2 * H:3 * H])
        o = jax.nn.sigmoid(gates[:, 3 * H:4 * H])
        c = f * c + i * g
        h = o * jnp.tanh(c)
    return h @ params["w_fc"].T + params["b_fc"]


def _init_params(key, input_dim, hidden_dim, output_dim):
    """Deterministic init mimicking PyTorch's U(-1/sqrt(H), 1/sqrt(H))."""
    ks = jax.random.split(key, 6)
    s = 1.0 / jnp.sqrt(hidden_dim)
    return {
        "w_ih": jax.random.uniform(ks[0], (4 * hidden_dim, input_dim), jnp.float32, -s, s),
        "w_hh": jax.random.uniform(ks[1], (4 * hidden_dim, hidden_dim), jnp.float32, -s, s),
        "b_ih": jax.random.uniform(ks[2], (4 * hidden_dim,), jnp.float32, -s, s),
        "b_hh": jax.random.uniform(ks[3], (4 * hidden_dim,), jnp.float32, -s, s),
        "w_fc": jax.random.uniform(ks[4], (output_dim, hidden_dim), jnp.float32, -s, s),
        "b_fc": jax.random.uniform(ks[5], (output_dim,), jnp.float32, -s, s),
    }


if __name__ == "__main__":
    B, T, D, H, O = 2, 8, 16, 32, 4   # batch, seq, input_dim, hidden_dim, output_dim

    key = jax.random.PRNGKey(0)
    k_x, k_p = jax.random.split(key)
    x = jax.random.normal(k_x, (B, T, D), jnp.float32)
    params = _init_params(k_p, D, H, O)

    ref = _reference_forward(x, params)

    # f32 weights: tight check against the pure-JAX reference.
    out_f32 = jax.block_until_ready(
        lstm_agent_forward(x, params, weight_dtype=jnp.float32))
    assert out_f32.shape == (B, O)
    assert jnp.allclose(out_f32, ref, rtol=5e-4, atol=5e-4), "f32 mismatch vs reference"

    # Default bf16 weights (full-rate MXU path); f32 state/accumulation kept.
    out_bf16 = jax.block_until_ready(lstm_agent_forward(x, params))
    assert out_bf16.shape == (B, O)
    assert jnp.allclose(out_bf16, ref, rtol=3e-2, atol=3e-2), "bf16 mismatch vs reference"

    print("KERNEL_OK")
</pallas_src>

<mosaic_0001>
module attributes {stable_mosaic.version = 11 : i64} {
  func.func @_lstm_recurrence_kernel(%arg0: i32, %arg1: i32, %arg2: memref<8x8x16xf32, #tpu.memory_space<vmem>>, %arg3: memref<16x512xf32, #tpu.memory_space<vmem>>, %arg4: memref<128x512xf32, #tpu.memory_space<vmem>>, %arg5: memref<1x512xf32, #tpu.memory_space<vmem>>, %arg6: memref<128x128xf32, #tpu.memory_space<vmem>>, %arg7: memref<1x128xf32, #tpu.memory_space<vmem>>, %arg8: memref<8x128xf32, #tpu.memory_space<vmem>>, %arg9: memref<8x128xf32, #tpu.memory_space<vmem>>, %arg10: memref<8x128xf32, #tpu.memory_space<vmem>>) attributes {dimension_semantics = [#tpu.dimension_semantics<parallel>, #tpu.dimension_semantics<arbitrary>], iteration_bounds = array<i64: 1, 1>, scalar_prefetch = 0 : i64, scratch_operands = 2 : i64, tpu.core_type = #tpu.core_type<tc>, window_params = [{transform_indices = @transform_0, window_bounds = array<i64: 8, 8, 16>}, {pipeline_mode = #tpu.pipeline_mode<synchronous>, transform_indices = @transform_1, window_bounds = array<i64: 16, 512>}, {pipeline_mode = #tpu.pipeline_mode<synchronous>, transform_indices = @transform_2, window_bounds = array<i64: 128, 512>}, {pipeline_mode = #tpu.pipeline_mode<synchronous>, transform_indices = @transform_3, window_bounds = array<i64: 1, 512>}, {pipeline_mode = #tpu.pipeline_mode<synchronous>, transform_indices = @transform_4, window_bounds = array<i64: 128, 128>}, {pipeline_mode = #tpu.pipeline_mode<synchronous>, transform_indices = @transform_5, window_bounds = array<i64: 1, 128>}, {transform_indices = @transform_6, window_bounds = array<i64: 8, 128>}]} {
    %c0_i32 = arith.constant 0 : i32
    %0 = arith.cmpi eq, %arg1, %c0_i32 : i32
    %1 = arith.extui %0 : i1 to i32
    %c0_i32_0 = arith.constant 0 : i32
    %2 = arith.cmpi ne, %1, %c0_i32_0 : i32
    scf.if %2 {
      %cst_72 = arith.constant 0.000000e+00 : f32
      %207 = vector.broadcast %cst_72 : f32 to vector<8x128xf32>
      %c0_73 = arith.constant 0 : index
      %c0_74 = arith.constant 0 : index
      %208 = vector.load %arg9[%c0_73, %c0_74] : memref<8x128xf32, #tpu.memory_space<vmem>>, vector<8x128xf32>
      tpu.vector_store %arg9[%c0_73, %c0_74], %207 {strides = array<i32>} : memref<8x128xf32, #tpu.memory_space<vmem>>, vector<8x128xf32>,
      %cst_75 = arith.constant 0.000000e+00 : f32
      %209 = vector.broadcast %cst_75 : f32 to vector<8x128xf32>
      %c0_76 = arith.constant 0 : index
      %c0_77 = arith.constant 0 : index
      %210 = vector.load %arg10[%c0_76, %c0_77] : memref<8x128xf32, #tpu.memory_space<vmem>>, vector<8x128xf32>
      tpu.vector_store %arg10[%c0_76, %c0_77], %209 {strides = array<i32>} : memref<8x128xf32, #tpu.memory_space<vmem>>, vector<8x128xf32>,
    } else {
    }
    %c0 = arith.constant 0 : index
    %c0_1 = arith.constant 0 : index
    %3 = vector.load %arg3[%c0, %c0_1] : memref<16x512xf32, #tpu.memory_space<vmem>>, vector<16x512xf32>
    %c0_2 = arith.constant 0 : index
    %c0_3 = arith.constant 0 : index
    %4 = vector.load %arg4[%c0_2, %c0_3] : memref<128x512xf32, #tpu.memory_space<vmem>>, vector<128x512xf32>
    %c0_4 = arith.constant 0 : index
    %c0_5 = arith.constant 0 : index
    %5 = vector.load %arg5[%c0_4, %c0_5] : memref<1x512xf32, #tpu.memory_space<vmem>>, vector<1x512xf32>
    %6 = vector.shape_cast %5 : vector<1x512xf32> to vector<1x512xf32>
    %7 = vector.broadcast %6 : vector<1x512xf32> to vector<8x512xf32>
    %c0_6 = arith.constant 0 : index
    %c0_7 = arith.constant 0 : index
    %8 = vector.load %arg9[%c0_6, %c0_7] : memref<8x128xf32, #tpu.memory_space<vmem>>, vector<8x128xf32>
    %c0_8 = arith.constant 0 : index
    %c0_9 = arith.constant 0 : index
    %9 = vector.load %arg10[%c0_8, %c0_9] : memref<8x128xf32, #tpu.memory_space<vmem>>, vector<8x128xf32>
    %c0_10 = arith.constant 0 : index
    %c0_11 = arith.constant 0 : index
    %c0_12 = arith.constant 0 : index
    %10 = vector.load %arg2[%c0_10, %c0_11, %c0_12] : memref<8x8x16xf32, #tpu.memory_space<vmem>>, vector<1x8x16xf32>
    %11 = vector.shape_cast %10 : vector<1x8x16xf32> to vector<8x16xf32>
    %cst = arith.constant dense<0.000000e+00> : vector<8x512xf32>
    %12 = tpu.matmul %11, %3, %cst {dimension_numbers = #tpu.dot_dimension_numbers<[1], [0], [0], [1], [0, 0, 1, 1], [], []>} : vector<8x16xf32>, vector<16x512xf32>, vector<8x512xf32> -> vector<8x512xf32>
    %13 = arith.addf %12, %7 : vector<8x512xf32>
    %cst_13 = arith.constant dense<0.000000e+00> : vector<8x512xf32>
    %14 = tpu.matmul %8, %4, %cst_13 {dimension_numbers = #tpu.dot_dimension_numbers<[1], [0], [0], [1], [0, 0, 1, 1], [], []>} : vector<8x128xf32>, vector<128x512xf32>, vector<8x512xf32> -> vector<8x512xf32>
    %15 = arith.addf %13, %14 : vector<8x512xf32>
    %16 = vector.extract_strided_slice %15 {offsets = [0, 0], sizes = [8, 384], strides = [1, 1]} : vector<8x512xf32> to vector<8x384xf32>
    %cst_14 = arith.constant 5.000000e-01 : f32
    %17 = vector.broadcast %cst_14 : f32 to vector<8x384xf32>
    %18 = arith.mulf %16, %17 : vector<8x384xf32>
    %19 = math.tanh %18 : vector<8x384xf32>
    %cst_15 = arith.constant 5.000000e-01 : f32
    %20 = vector.broadcast %cst_15 : f32 to vector<8x384xf32>
    %21 = arith.mulf %19, %20 : vector<8x384xf32>
    %cst_16 = arith.constant 5.000000e-01 : f32
    %22 = vector.broadcast %cst_16 : f32 to vector<8x384xf32>
    %23 = arith.addf %21, %22 : vector<8x384xf32>
    %24 = vector.extract_strided_slice %23 {offsets = [0, 0], sizes = [8, 128], strides = [1, 1]} : vector<8x384xf32> to vector<8x128xf32>
    %25 = vector.extract_strided_slice %23 {offsets = [0, 128], sizes = [8, 128], strides = [1, 1]} : vector<8x384xf32> to vector<8x128xf32>
    %26 = vector.extract_strided_slice %23 {offsets = [0, 256], sizes = [8, 128], strides = [1, 1]} : vector<8x384xf32> to vector<8x128xf32>
    %27 = vector.extract_strided_slice %15 {offsets = [0, 384], sizes = [8, 128], strides = [1, 1]} : vector<8x512xf32> to vector<8x128xf32>
    %28 = math.tanh %27 : vector<8x128xf32>
    %29 = arith.mulf %25, %9 : vector<8x128xf32>
    %30 = arith.mulf %24, %28 : vector<8x128xf32>
    %31 = arith.addf %29, %30 : vector<8x128xf32>
    %32 = math.tanh %31 : vector<8x128xf32>
    %33 = arith.mulf %26, %32 : vector<8x128xf32>
    %c1 = arith.constant 1 : index
    %c0_17 = arith.constant 0 : index
    %c0_18 = arith.constant 0 : index
    %34 = vector.load %arg2[%c1, %c0_17, %c0_18] : memref<8x8x16xf32, #tpu.memory_space<vmem>>, vector<1x8x16xf32>
    %35 = vector.shape_cast %34 : vector<1x8x16xf32> to vector<8x16xf32>
    %cst_19 = arith.constant dense<0.000000e+00> : vector<8x512xf32>
    %36 = tpu.matmul %35, %3, %cst_19 {dimension_numbers = #tpu.dot_dimension_numbers<[1], [0], [0], [1], [0, 0, 1, 1], [], []>} : vector<8x16xf32>, vector<16x512xf32>, vector<8x512xf32> -> vector<8x512xf32>
    %37 = arith.addf %36, %7 : vector<8x512xf32>
    %cst_20 = arith.constant dense<0.000000e+00> : vector<8x512xf32>
    %38 = tpu.matmul %33, %4, %cst_20 {dimension_numbers = #tpu.dot_dimension_numbers<[1], [0], [0], [1], [0, 0, 1, 1], [], []>} : vector<8x128xf32>, vector<128x512xf32>, vector<8x512xf32> -> vector<8x512xf32>
    %39 = arith.addf %37, %38 : vector<8x512xf32>
    %40 = vector.extract_strided_slice %39 {offsets = [0, 0], sizes = [8, 384], strides = [1, 1]} : vector<8x512xf32> to vector<8x384xf32>
    %cst_21 = arith.constant 5.000000e-01 : f32
    %41 = vector.broadcast %cst_21 : f32 to vector<8x384xf32>
    %42 = arith.mulf %40, %41 : vector<8x384xf32>
    %43 = math.tanh %42 : vector<8x384xf32>
    %cst_22 = arith.constant 5.000000e-01 : f32
    %44 = vector.broadcast %cst_22 : f32 to vector<8x384xf32>
    %45 = arith.mulf %43, %44 : vector<8x384xf32>
    %cst_23 = arith.constant 5.000000e-01 : f32
    %46 = vector.broadcast %cst_23 : f32 to vector<8x384xf32>
    %47 = arith.addf %45, %46 : vector<8x384xf32>
    %48 = vector.extract_strided_slice %47 {offsets = [0, 0], sizes = [8, 128], strides = [1, 1]} : vector<8x384xf32> to vector<8x128xf32>
    %49 = vector.extract_strided_slice %47 {offsets = [0, 128], sizes = [8, 128], strides = [1, 1]} : vector<8x384xf32> to vector<8x128xf32>
    %50 = vector.extract_strided_slice %47 {offsets = [0, 256], sizes = [8, 128], strides = [1, 1]} : vector<8x384xf32> to vector<8x128xf32>
    %51 = vector.extract_strided_slice %39 {offsets = [0, 384], sizes = [8, 128], strides = [1, 1]} : vector<8x512xf32> to vector<8x128xf32>
    %52 = math.tanh %51 : vector<8x128xf32>
    %53 = arith.mulf %49, %31 : vector<8x128xf32>
    %54 = arith.mulf %48, %52 : vector<8x128xf32>
    %55 = arith.addf %53, %54 : vector<8x128xf32>
    %56 = math.tanh %55 : vector<8x128xf32>
    %57 = arith.mulf %50, %56 : vector<8x128xf32>
    %c2 = arith.constant 2 : index
    %c0_24 = arith.constant 0 : index
    %c0_25 = arith.constant 0 : index
    %58 = vector.load %arg2[%c2, %c0_24, %c0_25] : memref<8x8x16xf32, #tpu.memory_space<vmem>>, vector<1x8x16xf32>
    %59 = vector.shape_cast %58 : vector<1x8x16xf32> to vector<8x16xf32>
    %cst_26 = arith.constant dense<0.000000e+00> : vector<8x512xf32>
    %60 = tpu.matmul %59, %3, %cst_26 {dimension_numbers = #tpu.dot_dimension_numbers<[1], [0], [0], [1], [0, 0, 1, 1], [], []>} : vector<8x16xf32>, vector<16x512xf32>, vector<8x512xf32> -> vector<8x512xf32>
    %61 = arith.addf %60, %7 : vector<8x512xf32>
    %cst_27 = arith.constant dense<0.000000e+00> : vector<8x512xf32>
    %62 = tpu.matmul %57, %4, %cst_27 {dimension_numbers = #tpu.dot_dimension_numbers<[1], [0], [0], [1], [0, 0, 1, 1], [], []>} : vector<8x128xf32>, vector<128x512xf32>, vector<8x512xf32> -> vector<8x512xf32>
    %63 = arith.addf %61, %62 : vector<8x512xf32>
    %64 = vector.extract_strided_slice %63 {offsets = [0, 0], sizes = [8, 384], strides = [1, 1]} : vector<8x512xf32> to vector<8x384xf32>
    %cst_28 = arith.constant 5.000000e-01 : f32
    %65 = vector.broadcast %cst_28 : f32 to vector<8x384xf32>
    %66 = arith.mulf %64, %65 : vector<8x384xf32>
    %67 = math.tanh %66 : vector<8x384xf32>
    %cst_29 = arith.constant 5.000000e-01 : f32
    %68 = vector.broadcast %cst_29 : f32 to vector<8x384xf32>
    %69 = arith.mulf %67, %68 : vector<8x384xf32>
    %cst_30 = arith.constant 5.000000e-01 : f32
    %70 = vector.broadcast %cst_30 : f32 to vector<8x384xf32>
    %71 = arith.addf %69, %70 : vector<8x384xf32>
    %72 = vector.extract_strided_slice %71 {offsets = [0, 0], sizes = [8, 128], strides = [1, 1]} : vector<8x384xf32> to vector<8x128xf32>
    %73 = vector.extract_strided_slice %71 {offsets = [0, 128], sizes = [8, 128], strides = [1, 1]} : vector<8x384xf32> to vector<8x128xf32>
    %74 = vector.extract_strided_slice %71 {offsets = [0, 256], sizes = [8, 128], strides = [1, 1]} : vector<8x384xf32> to vector<8x128xf32>
    %75 = vector.extract_strided_slice %63 {offsets = [0, 384], sizes = [8, 128], strides = [1, 1]} : vector<8x512xf32> to vector<8x128xf32>
    %76 = math.tanh %75 : vector<8x128xf32>
    %77 = arith.mulf %73, %55 : vector<8x128xf32>
    %78 = arith.mulf %72, %76 : vector<8x128xf32>
    %79 = arith.addf %77, %78 : vector<8x128xf32>
    %80 = math.tanh %79 : vector<8x128xf32>
    %81 = arith.mulf %74, %80 : vector<8x128xf32>
    %c3 = arith.constant 3 : index
    %c0_31 = arith.constant 0 : index
    %c0_32 = arith.constant 0 : index
    %82 = vector.load %arg2[%c3, %c0_31, %c0_32] : memref<8x8x16xf32, #tpu.memory_space<vmem>>, vector<1x8x16xf32>
    %83 = vector.shape_cast %82 : vector<1x8x16xf32> to vector<8x16xf32>
    %cst_33 = arith.constant dense<0.000000e+00> : vector<8x512xf32>
    %84 = tpu.matmul %83, %3, %cst_33 {dimension_numbers = #tpu.dot_dimension_numbers<[1], [0], [0], [1], [0, 0, 1, 1], [], []>} : vector<8x16xf32>, vector<16x512xf32>, vector<8x512xf32> -> vector<8x512xf32>
    %85 = arith.addf %84, %7 : vector<8x512xf32>
    %cst_34 = arith.constant dense<0.000000e+00> : vector<8x512xf32>
    %86 = tpu.matmul %81, %4, %cst_34 {dimension_numbers = #tpu.dot_dimension_numbers<[1], [0], [0], [1], [0, 0, 1, 1], [], []>} : vector<8x128xf32>, vector<128x512xf32>, vector<8x512xf32> -> vector<8x512xf32>
    %87 = arith.addf %85, %86 : vector<8x512xf32>
    %88 = vector.extract_strided_slice %87 {offsets = [0, 0], sizes = [8, 384], strides = [1, 1]} : vector<8x512xf32> to vector<8x384xf32>
    %cst_35 = arith.constant 5.000000e-01 : f32
    %89 = vector.broadcast %cst_35 : f32 to vector<8x384xf32>
    %90 = arith.mulf %88, %89 : vector<8x384xf32>
    %91 = math.tanh %90 : vector<8x384xf32>
    %cst_36 = arith.constant 5.000000e-01 : f32
    %92 = vector.broadcast %cst_36 : f32 to vector<8x384xf32>
    %93 = arith.mulf %91, %92 : vector<8x384xf32>
    %cst_37 = arith.constant 5.000000e-01 : f32
    %94 = vector.broadcast %cst_37 : f32 to vector<8x384xf32>
    %95 = arith.addf %93, %94 : vector<8x384xf32>
    %96 = vector.extract_strided_slice %95 {offsets = [0, 0], sizes = [8, 128], strides = [1, 1]} : vector<8x384xf32> to vector<8x128xf32>
    %97 = vector.extract_strided_slice %95 {offsets = [0, 128], sizes = [8, 128], strides = [1, 1]} : vector<8x384xf32> to vector<8x128xf32>
    %98 = vector.extract_strided_slice %95 {offsets = [0, 256], sizes = [8, 128], strides = [1, 1]} : vector<8x384xf32> to vector<8x128xf32>
    %99 = vector.extract_strided_slice %87 {offsets = [0, 384], sizes = [8, 128], strides = [1, 1]} : vector<8x512xf32> to vector<8x128xf32>
    %100 = math.tanh %99 : vector<8x128xf32>
    %101 = arith.mulf %97, %79 : vector<8x128xf32>
    %102 = arith.mulf %96, %100 : vector<8x128xf32>
    %103 = arith.addf %101, %102 : vector<8x128xf32>
    %104 = math.tanh %103 : vector<8x128xf32>
    %105 = arith.mulf %98, %104 : vector<8x128xf32>
    %c4 = arith.constant 4 : index
    %c0_38 = arith.constant 0 : index
    %c0_39 = arith.constant 0 : index
    %106 = vector.load %arg2[%c4, %c0_38, %c0_39] : memref<8x8x16xf32, #tpu.memory_space<vmem>>, vector<1x8x16xf32>
    %107 = vector.shape_cast %106 : vector<1x8x16xf32> to vector<8x16xf32>
    %cst_40 = arith.constant dense<0.000000e+00> : vector<8x512xf32>
    %108 = tpu.matmul %107, %3, %cst_40 {dimension_numbers = #tpu.dot_dimension_numbers<[1], [0], [0], [1], [0, 0, 1, 1], [], []>} : vector<8x16xf32>, vector<16x512xf32>, vector<8x512xf32> -> vector<8x512xf32>
    %109 = arith.addf %108, %7 : vector<8x512xf32>
    %cst_41 = arith.constant dense<0.000000e+00> : vector<8x512xf32>
    %110 = tpu.matmul %105, %4, %cst_41 {dimension_numbers = #tpu.dot_dimension_numbers<[1], [0], [0], [1], [0, 0, 1, 1], [], []>} : vector<8x128xf32>, vector<128x512xf32>, vector<8x512xf32> -> vector<8x512xf32>
    %111 = arith.addf %109, %110 : vector<8x512xf32>
    %112 = vector.extract_strided_slice %111 {offsets = [0, 0], sizes = [8, 384], strides = [1, 1]} : vector<8x512xf32> to vector<8x384xf32>
    %cst_42 = arith.constant 5.000000e-01 : f32
    %113 = vector.broadcast %cst_42 : f32 to vector<8x384xf32>
    %114 = arith.mulf %112, %113 : vector<8x384xf32>
    %115 = math.tanh %114 : vector<8x384xf32>
    %cst_43 = arith.constant 5.000000e-01 : f32
    %116 = vector.broadcast %cst_43 : f32 to vector<8x384xf32>
    %117 = arith.mulf %115, %116 : vector<8x384xf32>
    %cst_44 = arith.constant 5.000000e-01 : f32
    %118 = vector.broadcast %cst_44 : f32 to vector<8x384xf32>
    %119 = arith.addf %117, %118 : vector<8x384xf32>
    %120 = vector.extract_strided_slice %119 {offsets = [0, 0], sizes = [8, 128], strides = [1, 1]} : vector<8x384xf32> to vector<8x128xf32>
    %121 = vector.extract_strided_slice %119 {offsets = [0, 128], sizes = [8, 128], strides = [1, 1]} : vector<8x384xf32> to vector<8x128xf32>
    %122 = vector.extract_strided_slice %119 {offsets = [0, 256], sizes = [8, 128], strides = [1, 1]} : vector<8x384xf32> to vector<8x128xf32>
    %123 = vector.extract_strided_slice %111 {offsets = [0, 384], sizes = [8, 128], strides = [1, 1]} : vector<8x512xf32> to vector<8x128xf32>
    %124 = math.tanh %123 : vector<8x128xf32>
    %125 = arith.mulf %121, %103 : vector<8x128xf32>
    %126 = arith.mulf %120, %124 : vector<8x128xf32>
    %127 = arith.addf %125, %126 : vector<8x128xf32>
    %128 = math.tanh %127 : vector<8x128xf32>
    %129 = arith.mulf %122, %128 : vector<8x128xf32>
    %c5 = arith.constant 5 : index
    %c0_45 = arith.constant 0 : index
    %c0_46 = arith.constant 0 : index
    %130 = vector.load %arg2[%c5, %c0_45, %c0_46] : memref<8x8x16xf32, #tpu.memory_space<vmem>>, vector<1x8x16xf32>
    %131 = vector.shape_cast %130 : vector<1x8x16xf32> to vector<8x16xf32>
    %cst_47 = arith.constant dense<0.000000e+00> : vector<8x512xf32>
    %132 = tpu.matmul %131, %3, %cst_47 {dimension_numbers = #tpu.dot_dimension_numbers<[1], [0], [0], [1], [0, 0, 1, 1], [], []>} : vector<8x16xf32>, vector<16x512xf32>, vector<8x512xf32> -> vector<8x512xf32>
    %133 = arith.addf %132, %7 : vector<8x512xf32>
    %cst_48 = arith.constant dense<0.000000e+00> : vector<8x512xf32>
    %134 = tpu.matmul %129, %4, %cst_48 {dimension_numbers = #tpu.dot_dimension_numbers<[1], [0], [0], [1], [0, 0, 1, 1], [], []>} : vector<8x128xf32>, vector<128x512xf32>, vector<8x512xf32> -> vector<8x512xf32>
    %135 = arith.addf %133, %134 : vector<8x512xf32>
    %136 = vector.extract_strided_slice %135 {offsets = [0, 0], sizes = [8, 384], strides = [1, 1]} : vector<8x512xf32> to vector<8x384xf32>
    %cst_49 = arith.constant 5.000000e-01 : f32
    %137 = vector.broadcast %cst_49 : f32 to vector<8x384xf32>
    %138 = arith.mulf %136, %137 : vector<8x384xf32>
    %139 = math.tanh %138 : vector<8x384xf32>
    %cst_50 = arith.constant 5.000000e-01 : f32
    %140 = vector.broadcast %cst_50 : f32 to vector<8x384xf32>
    %141 = arith.mulf %139, %140 : vector<8x384xf32>
    %cst_51 = arith.constant 5.000000e-01 : f32
    %142 = vector.broadcast %cst_51 : f32 to vector<8x384xf32>
    %143 = arith.addf %141, %142 : vector<8x384xf32>
    %144 = vector.extract_strided_slice %143 {offsets = [0, 0], sizes = [8, 128], strides = [1, 1]} : vector<8x384xf32> to vector<8x128xf32>
    %145 = vector.extract_strided_slice %143 {offsets = [0, 128], sizes = [8, 128], strides = [1, 1]} : vector<8x384xf32> to vector<8x128xf32>
    %146 = vector.extract_strided_slice %143 {offsets = [0, 256], sizes = [8, 128], strides = [1, 1]} : vector<8x384xf32> to vector<8x128xf32>
    %147 = vector.extract_strided_slice %135 {offsets = [0, 384], sizes = [8, 128], strides = [1, 1]} : vector<8x512xf32> to vector<8x128xf32>
    %148 = math.tanh %147 : vector<8x128xf32>
    %149 = arith.mulf %145, %127 : vector<8x128xf32>
    %150 = arith.mulf %144, %148 : vector<8x128xf32>
    %151 = arith.addf %149, %150 : vector<8x128xf32>
    %152 = math.tanh %151 : vector<8x128xf32>
    %153 = arith.mulf %146, %152 : vector<8x128xf32>
    %c6 = arith.constant 6 : index
    %c0_52 = arith.constant 0 : index
    %c0_53 = arith.constant 0 : index
    %154 = vector.load %arg2[%c6, %c0_52, %c0_53] : memref<8x8x16xf32, #tpu.memory_space<vmem>>, vector<1x8x16xf32>
    %155 = vector.shape_cast %154 : vector<1x8x16xf32> to vector<8x16xf32>
    %cst_54 = arith.constant dense<0.000000e+00> : vector<8x512xf32>
    %156 = tpu.matmul %155, %3, %cst_54 {dimension_numbers = #tpu.dot_dimension_numbers<[1], [0], [0], [1], [0, 0, 1, 1], [], []>} : vector<8x16xf32>, vector<16x512xf32>, vector<8x512xf32> -> vector<8x512xf32>
    %157 = arith.addf %156, %7 : vector<8x512xf32>
    %cst_55 = arith.constant dense<0.000000e+00> : vector<8x512xf32>
    %158 = tpu.matmul %153, %4, %cst_55 {dimension_numbers = #tpu.dot_dimension_numbers<[1], [0], [0], [1], [0, 0, 1, 1], [], []>} : vector<8x128xf32>, vector<128x512xf32>, vector<8x512xf32> -> vector<8x512xf32>
    %159 = arith.addf %157, %158 : vector<8x512xf32>
    %160 = vector.extract_strided_slice %159 {offsets = [0, 0], sizes = [8, 384], strides = [1, 1]} : vector<8x512xf32> to vector<8x384xf32>
    %cst_56 = arith.constant 5.000000e-01 : f32
    %161 = vector.broadcast %cst_56 : f32 to vector<8x384xf32>
    %162 = arith.mulf %160, %161 : vector<8x384xf32>
    %163 = math.tanh %162 : vector<8x384xf32>
    %cst_57 = arith.constant 5.000000e-01 : f32
    %164 = vector.broadcast %cst_57 : f32 to vector<8x384xf32>
    %165 = arith.mulf %163, %164 : vector<8x384xf32>
    %cst_58 = arith.constant 5.000000e-01 : f32
    %166 = vector.broadcast %cst_58 : f32 to vector<8x384xf32>
    %167 = arith.addf %165, %166 : vector<8x384xf32>
    %168 = vector.extract_strided_slice %167 {offsets = [0, 0], sizes = [8, 128], strides = [1, 1]} : vector<8x384xf32> to vector<8x128xf32>
    %169 = vector.extract_strided_slice %167 {offsets = [0, 128], sizes = [8, 128], strides = [1, 1]} : vector<8x384xf32> to vector<8x128xf32>
    %170 = vector.extract_strided_slice %167 {offsets = [0, 256], sizes = [8, 128], strides = [1, 1]} : vector<8x384xf32> to vector<8x128xf32>
    %171 = vector.extract_strided_slice %159 {offsets = [0, 384], sizes = [8, 128], strides = [1, 1]} : vector<8x512xf32> to vector<8x128xf32>
    %172 = math.tanh %171 : vector<8x128xf32>
    %173 = arith.mulf %169, %151 : vector<8x128xf32>
    %174 = arith.mulf %168, %172 : vector<8x128xf32>
    %175 = arith.addf %173, %174 : vector<8x128xf32>
    %176 = math.tanh %175 : vector<8x128xf32>
    %177 = arith.mulf %170, %176 : vector<8x128xf32>
    %c7 = arith.constant 7 : index
    %c0_59 = arith.constant 0 : index
    %c0_60 = arith.constant 0 : index
    %178 = vector.load %arg2[%c7, %c0_59, %c0_60] : memref<8x8x16xf32, #tpu.memory_space<vmem>>, vector<1x8x16xf32>
    %179 = vector.shape_cast %178 : vector<1x8x16xf32> to vector<8x16xf32>
    %cst_61 = arith.constant dense<0.000000e+00> : vector<8x512xf32>
    %180 = tpu.matmul %179, %3, %cst_61 {dimension_numbers = #tpu.dot_dimension_numbers<[1], [0], [0], [1], [0, 0, 1, 1], [], []>} : vector<8x16xf32>, vector<16x512xf32>, vector<8x512xf32> -> vector<8x512xf32>
    %181 = arith.addf %180, %7 : vector<8x512xf32>
    %cst_62 = arith.constant dense<0.000000e+00> : vector<8x512xf32>
    %182 = tpu.matmul %177, %4, %cst_62 {dimension_numbers = #tpu.dot_dimension_numbers<[1], [0], [0], [1], [0, 0, 1, 1], [], []>} : vector<8x128xf32>, vector<128x512xf32>, vector<8x512xf32> -> vector<8x512xf32>
    %183 = arith.addf %181, %182 : vector<8x512xf32>
    %184 = vector.extract_strided_slice %183 {offsets = [0, 0], sizes = [8, 384], strides = [1, 1]} : vector<8x512xf32> to vector<8x384xf32>
    %cst_63 = arith.constant 5.000000e-01 : f32
    %185 = vector.broadcast %cst_63 : f32 to vector<8x384xf32>
    %186 = arith.mulf %184, %185 : vector<8x384xf32>
    %187 = math.tanh %186 : vector<8x384xf32>
    %cst_64 = arith.constant 5.000000e-01 : f32
    %188 = vector.broadcast %cst_64 : f32 to vector<8x384xf32>
    %189 = arith.mulf %187, %188 : vector<8x384xf32>
    %cst_65 = arith.constant 5.000000e-01 : f32
    %190 = vector.broadcast %cst_65 : f32 to vector<8x384xf32>
    %191 = arith.addf %189, %190 : vector<8x384xf32>
    %192 = vector.extract_strided_slice %191 {offsets = [0, 0], sizes = [8, 128], strides = [1, 1]} : vector<8x384xf32> to vector<8x128xf32>
    %193 = vector.extract_strided_slice %191 {offsets = [0, 128], sizes = [8, 128], strides = [1, 1]} : vector<8x384xf32> to vector<8x128xf32>
    %194 = vector.extract_strided_slice %191 {offsets = [0, 256], sizes = [8, 128], strides = [1, 1]} : vector<8x384xf32> to vector<8x128xf32>
    %195 = vector.extract_strided_slice %183 {offsets = [0, 384], sizes = [8, 128], strides = [1, 1]} : vector<8x512xf32> to vector<8x128xf32>
    %196 = math.tanh %195 : vector<8x128xf32>
    %197 = arith.mulf %193, %175 : vector<8x128xf32>
    %198 = arith.mulf %192, %196 : vector<8x128xf32>
    %199 = arith.addf %197, %198 : vector<8x128xf32>
    %200 = math.tanh %199 : vector<8x128xf32>
    %201 = arith.mulf %194, %200 : vector<8x128xf32>
    %c0_66 = arith.constant 0 : index
    %c0_67 = arith.constant 0 : index
    %202 = vector.load %arg9[%c0_66, %c0_67] : memref<8x128xf32, #tpu.memory_space<vmem>>, vector<8x128xf32>
    tpu.vector_store %arg9[%c0_66, %c0_67], %201 {strides = array<i32>} : memref<8x128xf32, #tpu.memory_space<vmem>>, vector<8x128xf32>,
    %c0_68 = arith.constant 0 : index
    %c0_69 = arith.constant 0 : index
    %203 = vector.load %arg10[%c0_68, %c0_69] : memref<8x128xf32, #tpu.memory_space<vmem>>, vector<8x128xf32>
    tpu.vector_store %arg10[%c0_68, %c0_69], %199 {strides = array<i32>} : memref<8x128xf32, #tpu.memory_space<vmem>>, vector<8x128xf32>,
    %c0_i32_70 = arith.constant 0 : i32
    %204 = arith.cmpi eq, %arg1, %c0_i32_70 : i32
    %205 = arith.extui %204 : i1 to i32
    %c0_i32_71 = arith.constant 0 : i32
    %206 = arith.cmpi ne, %205, %c0_i32_71 : i32
    scf.if %206 {
      %c0_72 = arith.constant 0 : index
      %c0_73 = arith.constant 0 : index
      %207 = vector.load %arg6[%c0_72, %c0_73] : memref<128x128xf32, #tpu.memory_space<vmem>>, vector<128x128xf32>
      %cst_74 = arith.constant dense<0.000000e+00> : vector<8x128xf32>
      %208 = tpu.matmul %201, %207, %cst_74 {dimension_numbers = #tpu.dot_dimension_numbers<[1], [0], [0], [1], [0, 0, 1, 1], [], []>} : vector<8x128xf32>, vector<128x128xf32>, vector<8x128xf32> -> vector<8x128xf32>
      %c0_75 = arith.constant 0 : index
      %c0_76 = arith.constant 0 : index
      %209 = vector.load %arg7[%c0_75, %c0_76] : memref<1x128xf32, #tpu.memory_space<vmem>>, vector<1x128xf32>
      %210 = vector.broadcast %209 : vector<1x128xf32> to vector<8x128xf32>
      %211 = arith.addf %208, %210 : vector<8x128xf32>
      %c0_77 = arith.constant 0 : index
      %c0_78 = arith.constant 0 : index
      %212 = vector.load %arg8[%c0_77, %c0_78] : memref<8x128xf32, #tpu.memory_space<vmem>>, vector<8x128xf32>
      tpu.vector_store %arg8[%c0_77, %c0_78], %211 {strides = array<i32>} : memref<8x128xf32, #tpu.memory_space<vmem>>, vector<8x128xf32>,
    } else {
    }
    return
  }
  func.func @transform_0(%arg0: i32, %arg1: i32) -> (i32, i32, i32) {
    %c0_i32 = arith.constant 0 : i32
    %c0_i32_0 = arith.constant 0 : i32
    return %arg1, %arg0, %c0_i32 : i32, i32, i32
  }
  func.func @transform_1(%arg0: i32, %arg1: i32) -> (i32, i32) {
    %c0_i32 = arith.constant 0 : i32
    %c0_i32_0 = arith.constant 0 : i32
    %c0_i32_1 = arith.constant 0 : i32
    return %c0_i32, %c0_i32_0 : i32, i32
  }
  func.func @transform_2(%arg0: i32, %arg1: i32) -> (i32, i32) {
    %c0_i32 = arith.constant 0 : i32
    %c0_i32_0 = arith.constant 0 : i32
    %c0_i32_1 = arith.constant 0 : i32
    return %c0_i32, %c0_i32_0 : i32, i32
  }
  func.func @transform_3(%arg0: i32, %arg1: i32) -> (i32, i32) {
    %c0_i32 = arith.constant 0 : i32
    %c0_i32_0 = arith.constant 0 : i32
    %c0_i32_1 = arith.constant 0 : i32
    return %c0_i32, %c0_i32_0 : i32, i32
  }
  func.func @transform_4(%arg0: i32, %arg1: i32) -> (i32, i32) {
    %c0_i32 = arith.constant 0 : i32
    %c0_i32_0 = arith.constant 0 : i32
    %c0_i32_1 = arith.constant 0 : i32
    return %c0_i32, %c0_i32_0 : i32, i32
  }
  func.func @transform_5(%arg0: i32, %arg1: i32) -> (i32, i32) {
    %c0_i32 = arith.constant 0 : i32
    %c0_i32_0 = arith.constant 0 : i32
    %c0_i32_1 = arith.constant 0 : i32
    return %c0_i32, %c0_i32_0 : i32, i32
  }
  func.func @transform_6(%arg0: i32, %arg1: i32) -> (i32, i32) {
    %c0_i32 = arith.constant 0 : i32
    %c0_i32_0 = arith.constant 0 : i32
    return %arg0, %c0_i32 : i32, i32
  }
}

</mosaic_0001>

<bundles_post_ra>
// kernel: tpu_custom_call.1
= control target key start
LH: loop header
LB: loop body
LE: loop exit
PB: predicated region body
PF: predicated region fallthrough
CT: control target
= control target key end

     0   :  { %11 = vsyncpa [#allocation5], 0  ;;  %s4339_s0 = inlined_call_operand.hbm [shape: f32[8,8,16], index: 0, kind: input, shape index: {}]   ;;  %s4340_s1 = inlined_call_operand.hbm [shape: f32[16,512], index: 1, kind: input, shape index: {}]   ;;  %s4341_s2 = inlined_call_operand.hbm [shape: f32[128,512], index: 2, kind: input, shape index: {}]   ;;  %s4342_s3 = inlined_call_operand.vmem [shape: f32[1,512], index: 3, kind: input, shape index: {}]   ;;  %s4343_s4 = inlined_call_operand.hbm [shape: f32[128,128], index: 4, kind: input, shape index: {}]   ;;  %s4344_s5 = inlined_call_operand.vmem [shape: f32[1,128], index: 5, kind: input, shape index: {}]   ;;  %s4345_s6 = inlined_call_operand.hbm [shape: f32[8,128], index: 6, kind: output, shape index: {}]  }
   0x1   :  { %12 = vsyncpa [#allocation8], 0 }
   0x2   :  { %13 = vsyncpa [#allocation11], 0 }
   0x3   :  { %14 = vsyncpa [#allocation6], 0  ;;  %s3728_s21 = smov [#allocation7]   ;;  %s3610_s25 = scalar_lea.hbm %s4340_s1, 1024 }
   0x4   :  { %s32_s22 = sshll.u32 %s3728_s21, 4  ;;  %p3611_p0 = scmp.ne.s32.totalorder %s4340_s1, %s3610_s25  ;;  %s33_s22 = int_to_ptr.vmem [resolvable:$true] %s32_s22 }
   0x5   :  { %p3614_p1 = scmp.lt.u32.totalorder %s3610_s25, %s4340_s1 }
   0x7   :  { %p3616_p2 = pnand %p3614_p1, %p3611_p0 }
   0x9   :  { %3619 = shalt.err (!%p3616_p2)
}
   0xa   :  { %s3620_s30 = scalar_lea.vmem %s33_s22, 1024  ;;  %p3625_p4 = scmp.lt.s32.totalorder %s33_s22, %s33_s22 }
   0xb   :  { %p3621_p3 = scmp.ne.s32.totalorder %s33_s22, %s3620_s30  ;;  %p3626_p5 = scmp.lt.s32.totalorder %s3620_s30, %s3620_s30 }
   0xd   :  { %p3627_p6 = por %p3626_p5, %p3625_p4 }
   0xf   :  { %p3628_p7 = pnand %p3627_p6, %p3621_p3 }
  0x11   :  { %3631 = shalt.err (!%p3628_p7)
}
  0x12   :  { %s3729_s7 = smov 512   ;;  %s3730_s8 = smov 32  }
  0x13   :  { %38 = dma.hbm_to_vmem [thread:$0]  %s4340_s1, 1024, %s33_s22, [#allocation8], %s3729_s7, %s3729_s7, %s3730_s8  }
  0x14   :  { %s3731_s11 = smov [#allocation4]   ;;  %s3632_s15 = scalar_lea.hbm %s4339_s0, 1024 }
  0x15   :  { %s20_s12 = sshll.u32 %s3731_s11, 4  ;;  %p3633_p8 = scmp.ne.s32.totalorder %s4339_s0, %s3632_s15  ;;  %s21_s12 = int_to_ptr.vmem [resolvable:$true] %s20_s12 }
  0x16   :  { %p3636_p9 = scmp.lt.u32.totalorder %s3632_s15, %s4339_s0 }
  0x18   :  { %p3638_p10 = pnand %p3636_p9, %p3633_p8 }
  0x1a   :  { %3641 = shalt.err (!%p3638_p10)
}
  0x1b   :  { %s3642_s20 = scalar_lea.vmem %s21_s12, 1024  ;;  %p3647_p12 = scmp.lt.s32.totalorder %s21_s12, %s21_s12 }
  0x1c   :  { %p3643_p11 = scmp.ne.s32.totalorder %s21_s12, %s3642_s20  ;;  %p3648_p13 = scmp.lt.s32.totalorder %s3642_s20, %s3642_s20 }
  0x1e   :  { %p3649_p0 = por %p3648_p13, %p3647_p12 }
  0x20   :  { %p3650_p1 = pnand %p3649_p0, %p3643_p11 }
  0x22   :  { %3653 = shalt.err (!%p3650_p1)
}
  0x23   :  { %s3732_s1 = smov 128   ;;  %s3733_s21 = smov 8  }
  0x24   :  { %26 = dma.hbm_to_vmem [thread:$0]  %s4339_s0, 1024, %s21_s12, [#allocation5], %s3732_s1, %s3732_s1, %s3733_s21  }
  0x25   :  { %s3734_s24 = smov [#allocation9]   ;;  %s3735_s26 = smov [#allocation10]  }
  0x26   :  { %s44_s25 = sshll.u32 %s3734_s24, 4  ;;  %s58_s27 = sshll.u32 %s3735_s26, 4  ;;  %s45_s25 = int_to_ptr.vmem [resolvable:$true] %s44_s25  ;;  %s3805_s27 = int_to_ptr.vmem [resolvable:$true] %s58_s27 }
  0x27   :  { %s3654_s30 = scalar_lea.hbm %s4341_s2, 8192 }
  0x28   :  { %p3655_p2 = scmp.ne.s32.totalorder %s4341_s2, %s3654_s30  ;;  %p3658_p3 = scmp.lt.u32.totalorder %s3654_s30, %s4341_s2 }
  0x2a   :  { %p3660_p4 = pnand %p3658_p3, %p3655_p2 }
  0x2c   :  { %3663 = shalt.err (!%p3660_p4)
}
  0x2d   :  { %s3664_s0 = scalar_lea.vmem %s45_s25, 8192  ;;  %p3669_p6 = scmp.lt.s32.totalorder %s45_s25, %s45_s25 }
  0x2e   :  { %p3665_p5 = scmp.ne.s32.totalorder %s45_s25, %s3664_s0  ;;  %p3670_p7 = scmp.lt.s32.totalorder %s3664_s0, %s3664_s0 }
  0x30   :  { %p3671_p8 = por %p3670_p7, %p3669_p6 }
  0x32   :  { %p3672_p9 = pnand %p3671_p8, %p3665_p5 }
  0x34   :  { %3675 = shalt.err (!%p3672_p9)
}
  0x35   :  { %50 = dma.hbm_to_vmem [thread:$0]  %s4341_s2, 8192, %s45_s25, [#allocation8], %s3729_s7, %s3729_s7, %s3730_s8  }
  0x36   :  { %s3676_s17 = scalar_lea.hbm %s4343_s4, 2048 }
  0x37   :  { %p3677_p10 = scmp.ne.s32.totalorder %s4343_s4, %s3676_s17  ;;  %p3680_p11 = scmp.lt.u32.totalorder %s3676_s17, %s4343_s4 }
  0x39   :  { %p3682_p12 = pnand %p3680_p11, %p3677_p10 }
  0x3b   :  { %3685 = shalt.err (!%p3682_p12)
}
  0x3c   :  { %s3686_s23 = scalar_lea.vmem %s3805_s27, 2048  ;;  %p3691_p0 = scmp.lt.s32.totalorder %s3805_s27, %s3805_s27 }
  0x3d   :  { %p3687_p13 = scmp.ne.s32.totalorder %s3805_s27, %s3686_s23  ;;  %p3692_p1 = scmp.lt.s32.totalorder %s3686_s23, %s3686_s23 }
  0x3f   :  { %p3693_p2 = por %p3692_p1, %p3691_p0 }
  0x41   :  { %p3694_p3 = pnand %p3693_p2, %p3687_p13 }
  0x43   :  { %3697 = shalt.err (!%p3694_p3)
}
  0x44   :  { %64 = dma.hbm_to_vmem [thread:$0]  %s4343_s4, 2048, %s3805_s27, [#allocation11], %s3732_s1, %s3732_s1, %s3733_s21  }
  0x45   :  { %3720 = dma.done.wait [#allocation5], 1024  }
  0x46   :  { %3721 = vsyncadd [#allocation5], 4294966272 }
  0x47   :  { %3722 = dma.done.wait [#allocation8], 9216  }
  0x48   :  { %3723 = vsyncadd [#allocation8], 4294958080 }
  0x49   :  { %3724 = dma.done.wait [#allocation11], 2048  }
  0x4a   :  { %3725 = vsyncadd [#allocation11], 4294965248  ;;  %v3736_v0 = vmov 0.0   ;;  %v86_v1 = vld [vmem:[#allocation7 + $0x8] sm:$0xff]  ;;  %v85_v6 = vld [vmem:[#allocation7] sm:$0xff]  ;;  %vm182_vm0 = vcmask 130048  }
  0x4b   :  { %250 = vmatprep.mubr.f32.mxu1 %v3736_v0  ;;  %392 = vmatprep.mubr.f32.mxu0 %v3736_v0  ;;  %v90_v2 = vld [vmem:[#allocation7 + $0x28] sm:$0xff]  ;;  %v89_v7 = vld [vmem:[#allocation7 + $0x20] sm:$0xff]  ;;  %v88_v14 = vld [vmem:[#allocation7 + $0x18] sm:$0xff]  ;;  %vm3738_vm1 = vmmov 0   ;;  %s3739_s21 = smov [#allocation12]  }
  0x4c   :  { %v94_v3 = vld [vmem:[#allocation9 + $0x8] sm:$0xff]  ;;  %v3844_v4 = vpack.c.bf16 %v90_v2, %v86_v1  ;;  %v3848_v9 = vpack.c.bf16 %v89_v7, %v85_v6  ;;  %v93_v10 = vld [vmem:[#allocation9] sm:$0xff]  ;;  %v92_v15 = vld [vmem:[#allocation7 + $0x38] sm:$0xff]  ;;  %s2774_s24 = sshll.u32 %s3739_s21, 4  ;;  %s2775_s24 = int_to_ptr.vmem [resolvable:$true] %s2774_s24 }
  0x4d   :  { %v98_v5 = vld [vmem:[#allocation9 + $0x28] sm:$0xff]  ;;  %v97_v11 = vld [vmem:[#allocation9 + $0x20] sm:$0xff]  ;;  %v3855_v17 = vpack.c.bf16 %v92_v15, %v88_v14  ;;  %v87_v19 = vld [vmem:[#allocation7 + $0x10] sm:$0xff]  ;;  %s3698_s25 = scalar_lea.vmem %s2775_s24, 128  ;;  %p3703_p5 = scmp.lt.s32.totalorder %s2775_s24, %s2775_s24 }
  0x4e   :  { %v3846_v8 = vpack.c.bf16 %v98_v5, %v94_v3  ;;  %v181_v12 = vld [vmem:[#allocation4] sm:$0xff]  ;;  %2855 = vmatprep.subr.bf16.mxu1 %v3844_v4  ;;  %v3851_v13 = vpack.c.bf16 %v97_v11, %v93_v10  ;;  %v102_v16 = vld [vmem:[#allocation9 + $0x48] sm:$0xff]  ;;  %v91_v20 = vld [vmem:[#allocation7 + $0x30] sm:$0xff]  ;;  %p3699_p4 = scmp.ne.s32.totalorder %s2775_s24, %s3698_s25  ;;  %p3704_p6 = scmp.lt.s32.totalorder %s3698_s25, %s3698_s25 }
  0x4f   :  { %2857 = vmatpush1.bf16.msra.mxu1 %v3848_v9  ;;  %v106_v18 = vld [vmem:[#allocation9 + $0x68] sm:$0xff]  ;;  %v3860_v22 = vpack.c.bf16 %v91_v20, %v87_v19  ;;  %v101_v23 = vld [vmem:[#allocation9 + $0x40] sm:$0xff]  ;;  %v96_v28 = vld [vmem:[#allocation9 + $0x18] sm:$0xff] }
  0x50   :  { %2863 = vmatprep.subr.bf16.mxu0 %v3846_v8  ;;  %v3858_v21 = vpack.c.bf16 %v106_v18, %v102_v16  ;;  %v105_v24 = vld [vmem:[#allocation9 + $0x60] sm:$0xff]  ;;  %v110_v25 = vld [vmem:[#allocation9 + $0x88] sm:$0xff]  ;;  %2859 = vmatprep.subr.bf16.mxu1 %v3855_v17  ;;  %v100_v29 = vld [vmem:[#allocation9 + $0x38] sm:$0xff]  ;;  %p3705_p7 = por %p3704_p6, %p3703_p5 }
  0x51   :  { %2865 = vmatpush1.bf16.msra.mxu0 %v3851_v13  ;;  %v3863_v26 = vpack.c.bf16 %v105_v24, %v101_v23  ;;  %v114_v27 = vld [vmem:[#allocation9 + $0xa8] sm:$0xff]  ;;  %v3869_v31 = vpack.c.bf16 %v100_v29, %v96_v28  ;;  %v109_v32 = vld [vmem:[#allocation9 + $0x80] sm:$0xff]  ;;  %v95_v34 = vld [vmem:[#allocation9 + $0x10] sm:$0xff] }
  0x52   :  { %2785 = vmatmul.mubr.msk.f32.vlgmr.msra.gmra.mrb[0].mxu1 %vm182_vm0, %v181_v12  ;;  %2867 = vmatprep.subr.bf16.mxu0 %v3858_v21  ;;  %v3867_v30 = vpack.c.bf16 %v114_v27, %v110_v25  ;;  %v113_v33 = vld [vmem:[#allocation9 + $0xa0] sm:$0xff]  ;;  %v99_v35 = vld [vmem:[#allocation9 + $0x30] sm:$0xff]  ;;  %v118_v36 = vld [vmem:[#allocation9 + $0xc8] sm:$0xff]  ;;  %p3706_p8 = pnand %p3705_p7, %p3699_p4 }
  0x53   :  { %2861 = vmatpush1.bf16.msra.mxu1 %v3860_v22  ;;  %321 = vmatprep.mubr.f32.mxu1 %v3736_v0  ;;  %v122_v37 = vld [vmem:[#allocation9 + $0xe8] sm:$0xff]  ;;  %v3875_v38 = vpack.c.bf16 %v113_v33, %v109_v32  ;;  %v3877_v39 = vpack.c.bf16 %v99_v35, %v95_v34  ;;  %v104_v40 = vld [vmem:[#allocation9 + $0x58] sm:$0xff]  ;;  %v117_v42 = vld [vmem:[#allocation9 + $0xc0] sm:$0xff] }
  0x54   :  { %2895 = vmatprep.subr.bf16.mxu1 %v3869_v31  ;;  %v108_v41 = vld [vmem:[#allocation9 + $0x78] sm:$0xff]  ;;  %v3880_v43 = vpack.c.bf16 %v122_v37, %v118_v36  ;;  %v121_v45 = vld [vmem:[#allocation9 + $0xe0] sm:$0xff]  ;;  %v103_v46 = vld [vmem:[#allocation9 + $0x50] sm:$0xff] }
  0x55   :  { %2869 = vmatpush1.bf16.msra.mxu0 %v3863_v26  ;;  %v3882_v44 = vpack.c.bf16 %v108_v41, %v104_v40  ;;  %v107_v47 = vld [vmem:[#allocation9 + $0x70] sm:$0xff]  ;;  %v126_v48 = vld [vmem:[#allocation9 + $0x108] sm:$0xff]  ;;  %v112_v50 = vld [vmem:[#allocation9 + $0x98] sm:$0xff]  ;;  %v3891_v53 = vpack.c.bf16 %v121_v45, %v117_v42 }
  0x56   :  { %2871 = vmatprep.subr.bf16.mxu0 %v3867_v30  ;;  %2786 = vmatmul.mubr.msk.f32.vlgmr.msra.gmra.mrb[2].mxu1 %vm182_vm0, %v181_v12  ;;  %v130_v49 = vld [vmem:[#allocation9 + $0x128] sm:$0xff]  ;;  %v3886_v51 = vpack.c.bf16 %v107_v47, %v103_v46  ;;  %v116_v52 = vld [vmem:[#allocation9 + $0xb8] sm:$0xff]  ;;  %v125_v55 = vld [vmem:[#allocation9 + $0x100] sm:$0xff] }
  0x57   :  { %2897 = vmatpush1.bf16.msra.mxu1 %v3877_v39  ;;  %463 = vmatprep.mubr.f32.mxu1 %v3736_v0  ;;  %v3893_v54 = vpack.c.bf16 %v116_v52, %v112_v50  ;;  %v111_v56 = vld [vmem:[#allocation9 + $0x90] sm:$0xff]  ;;  %v3896_v58 = vpack.c.bf16 %v130_v49, %v126_v48  ;;  %v129_v59 = vld [vmem:[#allocation9 + $0x120] sm:$0xff]  ;;  %v120_v60 = vld [vmem:[#allocation9 + $0xd8] sm:$0xff] }
  0x58   :  { %2899 = vmatprep.subr.bf16.mxu1 %v3882_v44  ;;  %v115_v57 = vld [vmem:[#allocation9 + $0xb0] sm:$0xff]  ;;  %v124_v61 = vld [vmem:[#allocation9 + $0xf8] sm:$0xff]  ;;  %v134_v62 = vld [vmem:[#allocation9 + $0x148] sm:$0xff]  ;;  %v3903_v2 = vpack.c.bf16 %v129_v59, %v125_v55 }
  0x59   :  { %2873 = vmatpush1.bf16.msra.mxu0 %v3875_v38  ;;  %v138_v63 = vld [vmem:[#allocation9 + $0x168] sm:$0xff]  ;;  %v3899_v1 = vpack.c.bf16 %v115_v57, %v111_v56  ;;  %v3905_v3 = vpack.c.bf16 %v124_v61, %v120_v60  ;;  %v133_v5 = vld [vmem:[#allocation9 + $0x140] sm:$0xff]  ;;  %v119_v6 = vld [vmem:[#allocation9 + $0xd0] sm:$0xff] }
  0x5a   :  { %2875 = vmatprep.subr.bf16.mxu0 %v3880_v43  ;;  %v123_v7 = vld [vmem:[#allocation9 + $0xf0] sm:$0xff]  ;;  %v3908_v10 = vpack.c.bf16 %v138_v63, %v134_v62  ;;  %v137_v11 = vld [vmem:[#allocation9 + $0x160] sm:$0xff]  ;;  %v128_v12 = vld [vmem:[#allocation9 + $0x118] sm:$0xff] }
  0x5b   :  { %2901 = vmatpush1.bf16.msra.mxu1 %v3886_v51  ;;  %v132_v14 = vld [vmem:[#allocation9 + $0x138] sm:$0xff]  ;;  %v142_v15 = vld [vmem:[#allocation9 + $0x188] sm:$0xff]  ;;  %v3911_v18 = vpack.c.bf16 %v123_v7, %v119_v6  ;;  %v3915_v19 = vpack.c.bf16 %v137_v11, %v133_v5  ;;  %v141_v23 = vld [vmem:[#allocation9 + $0x180] sm:$0xff] }
  0x5c   :  { %2903 = vmatprep.subr.bf16.mxu1 %v3893_v54  ;;  %v146_v16 = vld [vmem:[#allocation9 + $0x1a8] sm:$0xff]  ;;  %v3917_v20 = vpack.c.bf16 %v132_v14, %v128_v12  ;;  %v127_v24 = vld [vmem:[#allocation9 + $0x110] sm:$0xff]  ;;  %v145_v28 = vld [vmem:[#allocation9 + $0x1a0] sm:$0xff]  ;;  %v159_v12 = vlaneseq }
  0x5d   :  { %2877 = vmatpush1.bf16.msra.mxu0 %v3891_v53  ;;  %v131_v25 = vld [vmem:[#allocation9 + $0x130] sm:$0xff]  ;;  %v3920_v27 = vpack.c.bf16 %v146_v16, %v142_v15  ;;  %v136_v29 = vld [vmem:[#allocation9 + $0x158] sm:$0xff]  ;;  %v150_v33 = vld [vmem:[#allocation9 + $0x1c8] sm:$0xff]  ;;  %v3927_v36 = vpack.c.bf16 %v145_v28, %v141_v23 }
  0x5e   :  { %2879 = vmatprep.subr.bf16.mxu0 %v3896_v58  ;;  %v140_v32 = vld [vmem:[#allocation9 + $0x178] sm:$0xff]  ;;  %v154_v34 = vld [vmem:[#allocation9 + $0x1e8] sm:$0xff]  ;;  %v3923_v35 = vpack.c.bf16 %v131_v25, %v127_v24  ;;  %v149_v40 = vld [vmem:[#allocation9 + $0x1c0] sm:$0xff]  ;;  %v160_v14 = vshrl.u32 %v159_v12, 7 }
  0x5f   :  { %2905 = vmatpush1.bf16.msra.mxu1 %v3899_v1  ;;  %v3929_v37 = vpack.c.bf16 %v140_v32, %v136_v29  ;;  %v135_v41 = vld [vmem:[#allocation9 + $0x150] sm:$0xff]  ;;  %v3932_v45 = vpack.c.bf16 %v154_v34, %v150_v33  ;;  %v153_v46 = vld [vmem:[#allocation9 + $0x1e0] sm:$0xff]  ;;  %v144_v47 = vld [vmem:[#allocation9 + $0x198] sm:$0xff] }
  0x60   :  { %2907 = vmatprep.subr.bf16.mxu1 %v3905_v3  ;;  %v139_v42 = vld [vmem:[#allocation9 + $0x170] sm:$0xff]  ;;  %v148_v48 = vld [vmem:[#allocation9 + $0x1b8] sm:$0xff]  ;;  %v3939_v50 = vpack.c.bf16 %v153_v46, %v149_v40  ;;  %v493_v6 = vld [vmem:[#allocation4 + $0x8] sm:$0xff]  ;;  %v161_v15 = vsub.s32 0, %v160_v14  ;;  %v165_v23 = vsub.s32 1, %v160_v14  ;;  %v173_v40 = vsub.s32 3, %v160_v14 }
  0x61   :  { %2881 = vmatpush1.bf16.msra.mxu0 %v3903_v2  ;;  %v3935_v49 = vpack.c.bf16 %v139_v42, %v135_v41  ;;  %v3941_v52 = vpack.c.bf16 %v148_v48, %v144_v47  ;;  %v143_v55 = vld [vmem:[#allocation9 + $0x190] sm:$0xff]  ;;  %v152_v57 = vld [vmem:[#allocation9 + $0x1d8] sm:$0xff]  ;;  %v157_v16 = vld [vmem:[%s4342_s3] sm:$0xf]  ;;  %v169_v42 = vsub.s32 2, %v160_v14 }
  0x62   :  { %2883 = vmatprep.subr.bf16.mxu0 %v3908_v10  ;;  %v147_v56 = vld [vmem:[#allocation9 + $0x1b0] sm:$0xff]  ;;  %v156_v59 = vld [vmem:[#allocation9 + $0x1f8] sm:$0xff]  ;;  %v4005_v24 = vrot.slane %v157_v16, %v161_v15  ;;  %v4007_v25 = vrot.slane %v157_v16, %v165_v23  ;;  %v4011_v48 = vrot.slane %v157_v16, %v173_v40 }
  0x63   :  { %2909 = vmatpush1.bf16.msra.mxu1 %v3911_v18  ;;  %v3945_v60 = vpack.c.bf16 %v147_v56, %v143_v55  ;;  %v3949_v61 = vpack.c.bf16 %v156_v59, %v152_v57  ;;  %v151_v62 = vld [vmem:[#allocation9 + $0x1d0] sm:$0xff]  ;;  %v4013_v55 = vrot.slane %v157_v16, %v169_v42 }
  0x64   :  { %2911 = vmatprep.subr.bf16.mxu1 %v3917_v20  ;;  %v155_v63 = vld [vmem:[#allocation9 + $0x1f0] sm:$0xff] }
  0x65   :  { %2885 = vmatpush1.bf16.msra.mxu0 %v3915_v19  ;;  %v3954_v5 = vpack.c.bf16 %v155_v63, %v151_v62 }
  0x66   :  { %2887 = vmatprep.subr.bf16.mxu0 %v3920_v27 }
  0x67   :  { %2913 = vmatpush1.bf16.msra.mxu1 %v3923_v35 }
  0x68   :  { %2915 = vmatprep.subr.bf16.mxu1 %v3929_v37 }
  0x69   :  { %2889 = vmatpush1.bf16.msra.mxu0 %v3927_v36 }
  0x6a   :  { %2891 = vmatprep.subr.bf16.mxu0 %v3932_v45 }
  0x6b   :  { %2917 = vmatpush1.bf16.msra.mxu1 %v3935_v49 }
  0x6c   :  { %2919 = vmatprep.subr.bf16.mxu1 %v3941_v52 }
  0x6d   :  { %2893 = vmatpush1.bf16.msra.mxu0 %v3939_v50 }
  0x6e   :  { %2935 = vmatprep.subr.bf16.mxu0 %v3846_v8 }
  0x6f   :  { %2921 = vmatpush1.bf16.msra.mxu1 %v3945_v60 }
  0x70   :  { %393 = vmatmul.mubr.f32.vlgmr.msra.gmra.mrb[0].mxu0 %v3736_v0  ;;  %2923 = vmatprep.subr.bf16.mxu1 %v3949_v61 }
  0x71   :  { %2937 = vmatpush1.bf16.msra.mxu0 %v3851_v13  ;;  %703 = vmatprep.mubr.f32.mxu0 %v3736_v0 }
  0x72   :  { %2939 = vmatprep.subr.bf16.mxu0 %v3858_v21 }
  0x73   :  { %2925 = vmatpush1.bf16.msra.mxu1 %v3954_v5 }
  0x74   :  { %2927 = vmatprep.subr.bf16.mxu1 %v3844_v4 }
  0x75   :  { %2941 = vmatpush1.bf16.msra.mxu0 %v3863_v26 }
  0x76   :  { %2943 = vmatprep.subr.bf16.mxu0 %v3867_v30  ;;  %464 = vmatmul.mubr.f32.vlgmr.msra.gmra.mrb[2].mxu1 %v3736_v0 }
  0x77   :  { %2929 = vmatpush1.bf16.msra.mxu1 %v3848_v9  ;;  %561 = vmatprep.mubr.f32.mxu1 %v3736_v0 }
  0x78   :  { %2931 = vmatprep.subr.bf16.mxu1 %v3855_v17 }
  0x79   :  { %2945 = vmatpush1.bf16.msra.mxu0 %v3875_v38 }
  0x7a   :  { %2947 = vmatprep.subr.bf16.mxu0 %v3880_v43  ;;  %2787 = vmatmul.mubr.msk.f32.vlgmr.msra.gmra.mrb[4].mxu1 %vm182_vm0, %v493_v6 }
  0x7b   :  { %2933 = vmatpush1.bf16.msra.mxu1 %v3860_v22  ;;  %632 = vmatprep.mubr.f32.mxu1 %v3736_v0 }
  0x7c   :  { %2967 = vmatprep.subr.bf16.mxu1 %v3869_v31 }
  0x7d   :  { %2949 = vmatpush1.bf16.msra.mxu0 %v3891_v53 }
  0x7e   :  { %2951 = vmatprep.subr.bf16.mxu0 %v3896_v58  ;;  %2788 = vmatmul.mubr.msk.f32.vlgmr.msra.gmra.mrb[6].mxu1 %vm182_vm0, %v493_v6 }
  0x7f   :  { %2969 = vmatpush1.bf16.msra.mxu1 %v3877_v39  ;;  %774 = vmatprep.mubr.f32.mxu1 %v3736_v0 }
  0x80   :  { %2971 = vmatprep.subr.bf16.mxu1 %v3882_v44 }
  0x81   :  { %2953 = vmatpush1.bf16.msra.mxu0 %v3903_v2 }
  0x82   :  { %2955 = vmatprep.subr.bf16.mxu0 %v3908_v10 }
  0x83   :  { %2973 = vmatpush1.bf16.msra.mxu1 %v3886_v51 }
  0x84   :  { %2975 = vmatprep.subr.bf16.mxu1 %v3893_v54 }
  0x85   :  { %2957 = vmatpush1.bf16.msra.mxu0 %v3915_v19 }
  0x86   :  { %2959 = vmatprep.subr.bf16.mxu0 %v3920_v27 }
  0x87   :  { %2977 = vmatpush1.bf16.msra.mxu1 %v3899_v1 }
  0x88   :  { %2979 = vmatprep.subr.bf16.mxu1 %v3905_v3 }
  0x89   :  { %2961 = vmatpush1.bf16.msra.mxu0 %v3927_v36 }
  0x8a   :  { %2963 = vmatprep.subr.bf16.mxu0 %v3932_v45 }
  0x8b   :  { %2981 = vmatpush1.bf16.msra.mxu1 %v3911_v18 }
  0x8c   :  { %2983 = vmatprep.subr.bf16.mxu1 %v3917_v20 }
  0x8d   :  { %2965 = vmatpush1.bf16.msra.mxu0 %v3939_v50 }
  0x8e   :  { %3007 = vmatprep.subr.bf16.mxu0 %v3846_v8 }
  0x8f   :  { %2985 = vmatpush1.bf16.msra.mxu1 %v3923_v35 }
  0x90   :  { %2987 = vmatprep.subr.bf16.mxu1 %v3929_v37 }
  0x93   :  { %2989 = vmatpush1.bf16.msra.mxu1 %v3935_v49 }
  0x94   :  { %2991 = vmatprep.subr.bf16.mxu1 %v3941_v52 }
  0x97   :  { %2993 = vmatpush1.bf16.msra.mxu1 %v3945_v60 }
  0x98   :  { %2995 = vmatprep.subr.bf16.mxu1 %v3949_v61 }
  0x9b   :  { %2997 = vmatpush1.bf16.msra.mxu1 %v3954_v5 }
  0x9c   :  { %2999 = vmatprep.subr.bf16.mxu1 %v3844_v4 }
 0x125   :  { %v252_v7 = vpop.f32.mrb[0].mxu1 }
 0x126   :  { %v254_v11 = vpop.f32.mrb[1].mxu1  ;;  %v253_v28 = vadd.f32 %v252_v7, %v4005_v24 }
 0x127   :  { %v255_v29 = vadd.f32 %v254_v11, %v4007_v25 }
 0x143   :  { %v394_v32 = vpop.f32.mrb[0].mxu0 }
 0x144   :  { %v470_v33 = vadd.f32 %v394_v32, %v253_v28  ;;  %v396_v34 = vpop.f32.mrb[1].mxu0 }
 0x145   :  { %v471_v41 = vadd.f32 %v396_v34, %v255_v29 }
 0x146   :  { %v474_v46 = vmul.f32 0.5, %v470_v33 }
 0x147   :  { %v475_v47 = vmul.f32 0.5, %v471_v41 }
 0x148   :  { %3530 = vtanh.f32 %v474_v46 }
 0x149   :  { %3532 = vtanh.f32 %v475_v47  ;;  %v465_v56 = vpop.f32.mrb[2].mxu1  ;;  %v804_v47 = vld [vmem:[#allocation4 + $0x10] sm:$0xff] }
 0x14a   :  { %v467_v57 = vpop.f32.mrb[3].mxu1  ;;  %v3458_v62 = vadd.f32 %v465_v56, %v4013_v55 }
 0x14b   :  { %v3459_v59 = vadd.f32 %v467_v57, %v4011_v48 }
 0x14c   :  { %v476_v63 = vmul.f32 0.5, %v3458_v62 }
 0x14d   :  { %3534 = vtanh.f32 %v3459_v59  ;;  %v563_v42 = vpop.f32.mrb[4].mxu1 }
 0x14e   :  { %3536 = vtanh.f32 %v476_v63  ;;  %v565_v46 = vpop.f32.mrb[5].mxu1  ;;  %v564_v56 = vadd.f32 %v563_v42, %v4005_v24 }
 0x14f   :  { %v566_v57 = vadd.f32 %v565_v46, %v4007_v25 }
 0x152   :  { %v3531_v6 = vpop.eup %3530 }
 0x153   :  { %v3533_v7 = vpop.eup %3532  ;;  %v480_v11 = vmul.f32 0.5, %v3531_v6 }
 0x154   :  { %v481_v12 = vmul.f32 0.5, %v3533_v7 }
 0x155   :  { %v483_v15 = vadd.f32 0.5, %v480_v11 }
 0x156   :  { %v484_v14 = vadd.f32 0.5, %v481_v12 }
 0x157   :  { %v3535_v23 = vpop.eup %3534 }
 0x158   :  { %v487_v28 = vmul.f32 0.0, %v484_v14  ;;  %v488_v29 = vmul.f32 %v3535_v23, %v483_v15  ;;  %v3537_v32 = vpop.eup %3536 }
 0x159   :  { %v482_v33 = vmul.f32 0.5, %v3537_v32 }
 0x15a   :  { %v4017_v16 = vadd.f32 %v488_v29, %v487_v28 }
 0x15b   :  { %v485_v34 = vadd.f32 0.5, %v482_v33 }
 0x15c   :  { %3538 = vtanh.f32 %v4017_v16 }
 0x166   :  { %v3539_v40 = vpop.eup %3538 }
 0x167   :  { %v491_v41 = vmul.f32 %v3539_v40, %v485_v34 }
 0x169   :  { %704 = vmatmul.mubr.f32.vlgmr.msra.gmra.mrb[2].mxu0 %v491_v41  ;;  %775 = vmatmul.mubr.f32.vlgmr.msra.gmra.mrb[6].mxu1 %v491_v41 }
 0x16a   :  { %3001 = vmatpush1.bf16.msra.mxu1 %v3848_v9  ;;  %872 = vmatprep.mubr.f32.mxu1 %v3736_v0 }
 0x16b   :  { %3003 = vmatprep.subr.bf16.mxu1 %v3855_v17  ;;  %3009 = vmatpush1.bf16.msra.mxu0 %v3851_v13 }
 0x16c   :  { %3011 = vmatprep.subr.bf16.mxu0 %v3858_v21  ;;  %1014 = vmatprep.mubr.f32.mxu0 %v3736_v0 }
 0x16d   :  { %2789 = vmatmul.mubr.msk.f32.vlgmr.msra.gmra.mrb[8].mxu1 %vm182_vm0, %v804_v47 }
 0x16e   :  { %3005 = vmatpush1.bf16.msra.mxu1 %v3860_v22  ;;  %943 = vmatprep.mubr.f32.mxu1 %v3736_v0 }
 0x16f   :  { %3013 = vmatpush1.bf16.msra.mxu0 %v3863_v26  ;;  %3039 = vmatprep.subr.bf16.mxu1 %v3869_v31 }
 0x170   :  { %3015 = vmatprep.subr.bf16.mxu0 %v3867_v30 }
 0x171   :  { %2790 = vmatmul.mubr.msk.f32.vlgmr.msra.gmra.mrb[10].mxu1 %vm182_vm0, %v804_v47 }
 0x172   :  { %3041 = vmatpush1.bf16.msra.mxu1 %v3877_v39  ;;  %1085 = vmatprep.mubr.f32.mxu1 %v3736_v0 }
 0x173   :  { %3017 = vmatpush1.bf16.msra.mxu0 %v3875_v38  ;;  %3043 = vmatprep.subr.bf16.mxu1 %v3882_v44 }
 0x174   :  { %3019 = vmatprep.subr.bf16.mxu0 %v3880_v43 }
 0x176   :  { %3045 = vmatpush1.bf16.msra.mxu1 %v3886_v51 }
 0x177   :  { %3021 = vmatpush1.bf16.msra.mxu0 %v3891_v53  ;;  %3047 = vmatprep.subr.bf16.mxu1 %v3893_v54 }
 0x178   :  { %3023 = vmatprep.subr.bf16.mxu0 %v3896_v58 }
 0x17a   :  { %3049 = vmatpush1.bf16.msra.mxu1 %v3899_v1 }
 0x17b   :  { %3025 = vmatpush1.bf16.msra.mxu0 %v3903_v2  ;;  %3051 = vmatprep.subr.bf16.mxu1 %v3905_v3 }
 0x17c   :  { %3027 = vmatprep.subr.bf16.mxu0 %v3908_v10 }
 0x17e   :  { %3053 = vmatpush1.bf16.msra.mxu1 %v3911_v18 }
 0x17f   :  { %3029 = vmatpush1.bf16.msra.mxu0 %v3915_v19  ;;  %3055 = vmatprep.subr.bf16.mxu1 %v3917_v20 }
 0x180   :  { %3031 = vmatprep.subr.bf16.mxu0 %v3920_v27 }
 0x182   :  { %3057 = vmatpush1.bf16.msra.mxu1 %v3923_v35 }
 0x183   :  { %3033 = vmatpush1.bf16.msra.mxu0 %v3927_v36  ;;  %3059 = vmatprep.subr.bf16.mxu1 %v3929_v37 }
 0x184   :  { %3035 = vmatprep.subr.bf16.mxu0 %v3932_v45 }
 0x186   :  { %3061 = vmatpush1.bf16.msra.mxu1 %v3935_v49 }
 0x187   :  { %3037 = vmatpush1.bf16.msra.mxu0 %v3939_v50  ;;  %3063 = vmatprep.subr.bf16.mxu1 %v3941_v52 }
 0x188   :  { %3079 = vmatprep.subr.bf16.mxu0 %v3846_v8 }
 0x18a   :  { %3065 = vmatpush1.bf16.msra.mxu1 %v3945_v60 }
 0x18b   :  { %3067 = vmatprep.subr.bf16.mxu1 %v3949_v61 }
 0x18e   :  { %3069 = vmatpush1.bf16.msra.mxu1 %v3954_v5 }
 0x18f   :  { %3071 = vmatprep.subr.bf16.mxu1 %v3844_v4 }
 0x23c   :  { %v705_v59 = vpop.f32.mrb[2].mxu0  ;;  %v776_v62 = vpop.f32.mrb[6].mxu1 }
 0x23d   :  { %v781_v63 = vadd.f32 %v705_v59, %v564_v56  ;;  %v707_v6 = vpop.f32.mrb[3].mxu0  ;;  %v778_v7 = vpop.f32.mrb[7].mxu1  ;;  %v3464_v23 = vadd.f32 %v776_v62, %v4013_v55 }
 0x23e   :  { %v782_v11 = vadd.f32 %v707_v6, %v566_v57  ;;  %v3465_v15 = vadd.f32 %v778_v7, %v4011_v48 }
 0x23f   :  { %v785_v12 = vmul.f32 0.5, %v781_v63  ;;  %v787_v28 = vmul.f32 0.5, %v3464_v23 }
 0x240   :  { %v786_v14 = vmul.f32 0.5, %v782_v11  ;;  %v1115_v11 = vld [vmem:[#allocation4 + $0x18] sm:$0xff] }
 0x241   :  { %3540 = vtanh.f32 %v785_v12 }
 0x242   :  { %3542 = vtanh.f32 %v786_v14 }
 0x243   :  { %3544 = vtanh.f32 %v3465_v15 }
 0x244   :  { %3546 = vtanh.f32 %v787_v28 }
 0x24b   :  { %v3541_v29 = vpop.eup %3540 }
 0x24c   :  { %v791_v32 = vmul.f32 0.5, %v3541_v29  ;;  %v3543_v33 = vpop.eup %3542 }
 0x24d   :  { %v792_v40 = vmul.f32 0.5, %v3543_v33  ;;  %v3545_v41 = vpop.eup %3544 }
 0x24e   :  { %v794_v34 = vadd.f32 0.5, %v791_v32  ;;  %v3547_v57 = vpop.eup %3546 }
 0x24f   :  { %v795_v42 = vadd.f32 0.5, %v792_v40  ;;  %v793_v59 = vmul.f32 0.5, %v3547_v57 }
 0x250   :  { %v799_v46 = vmul.f32 %v3545_v41, %v794_v34 }
 0x251   :  { %v798_v47 = vmul.f32 %v795_v42, %v4017_v16  ;;  %v796_v63 = vadd.f32 0.5, %v793_v59  ;;  %v874_v16 = vpop.f32.mrb[8].mxu1 }
 0x252   :  { %v876_v7 = vpop.f32.mrb[9].mxu1  ;;  %v875_v12 = vadd.f32 %v874_v16, %v4005_v24 }
 0x253   :  { %v4067_v56 = vadd.f32 %v799_v46, %v798_v47  ;;  %v877_v14 = vadd.f32 %v876_v7, %v4007_v25 }
 0x255   :  { %3548 = vtanh.f32 %v4067_v56 }
 0x25f   :  { %v3549_v62 = vpop.eup %3548 }
 0x260   :  { %v802_v6 = vmul.f32 %v3549_v62, %v796_v63 }
 0x262   :  { %1015 = vmatmul.mubr.f32.vlgmr.msra.gmra.mrb[4].mxu0 %v802_v6  ;;  %1086 = vmatmul.mubr.f32.vlgmr.msra.gmra.mrb[10].mxu1 %v802_v6 }
 0x263   :  { %3073 = vmatpush1.bf16.msra.mxu1 %v3848_v9  ;;  %1183 = vmatprep.mubr.f32.mxu1 %v3736_v0 }
 0x264   :  { %3075 = vmatprep.subr.bf16.mxu1 %v3855_v17  ;;  %3081 = vmatpush1.bf16.msra.mxu0 %v3851_v13 }
 0x265   :  { %3083 = vmatprep.subr.bf16.mxu0 %v3858_v21  ;;  %1325 = vmatprep.mubr.f32.mxu0 %v3736_v0 }
 0x266   :  { %2791 = vmatmul.mubr.msk.f32.vlgmr.msra.gmra.mrb[12].mxu1 %vm182_vm0, %v1115_v11 }
 0x267   :  { %3077 = vmatpush1.bf16.msra.mxu1 %v3860_v22  ;;  %1254 = vmatprep.mubr.f32.mxu1 %v3736_v0 }
 0x268   :  { %3085 = vmatpush1.bf16.msra.mxu0 %v3863_v26  ;;  %3111 = vmatprep.subr.bf16.mxu1 %v3869_v31 }
 0x269   :  { %3087 = vmatprep.subr.bf16.mxu0 %v3867_v30 }
 0x26a   :  { %2792 = vmatmul.mubr.msk.f32.vlgmr.msra.gmra.mrb[14].mxu1 %vm182_vm0, %v1115_v11 }
 0x26b   :  { %3113 = vmatpush1.bf16.msra.mxu1 %v3877_v39  ;;  %1396 = vmatprep.mubr.f32.mxu1 %v3736_v0 }
 0x26c   :  { %3089 = vmatpush1.bf16.msra.mxu0 %v3875_v38  ;;  %3115 = vmatprep.subr.bf16.mxu1 %v3882_v44 }
 0x26d   :  { %3091 = vmatprep.subr.bf16.mxu0 %v3880_v43 }
 0x26f   :  { %3117 = vmatpush1.bf16.msra.mxu1 %v3886_v51 }
 0x270   :  { %3093 = vmatpush1.bf16.msra.mxu0 %v3891_v53  ;;  %3119 = vmatprep.subr.bf16.mxu1 %v3893_v54 }
 0x271   :  { %3095 = vmatprep.subr.bf16.mxu0 %v3896_v58 }
 0x273   :  { %3121 = vmatpush1.bf16.msra.mxu1 %v3899_v1 }
 0x274   :  { %3097 = vmatpush1.bf16.msra.mxu0 %v3903_v2  ;;  %3123 = vmatprep.subr.bf16.mxu1 %v3905_v3 }
 0x275   :  { %3099 = vmatprep.subr.bf16.mxu0 %v3908_v10 }
 0x277   :  { %3125 = vmatpush1.bf16.msra.mxu1 %v3911_v18 }
 0x278   :  { %3101 = vmatpush1.bf16.msra.mxu0 %v3915_v19  ;;  %3127 = vmatprep.subr.bf16.mxu1 %v3917_v20 }
 0x279   :  { %3103 = vmatprep.subr.bf16.mxu0 %v3920_v27 }
 0x27b   :  { %3129 = vmatpush1.bf16.msra.mxu1 %v3923_v35 }
 0x27c   :  { %3105 = vmatpush1.bf16.msra.mxu0 %v3927_v36  ;;  %3131 = vmatprep.subr.bf16.mxu1 %v3929_v37 }
 0x27d   :  { %3107 = vmatprep.subr.bf16.mxu0 %v3932_v45 }
 0x27f   :  { %3133 = vmatpush1.bf16.msra.mxu1 %v3935_v49 }
 0x280   :  { %3109 = vmatpush1.bf16.msra.mxu0 %v3939_v50  ;;  %3135 = vmatprep.subr.bf16.mxu1 %v3941_v52 }
 0x281   :  { %3143 = vmatprep.subr.bf16.mxu0 %v3844_v4 }
 0x283   :  { %3137 = vmatpush1.bf16.msra.mxu1 %v3945_v60 }
 0x284   :  { %3139 = vmatprep.subr.bf16.mxu1 %v3949_v61 }
 0x287   :  { %3141 = vmatpush1.bf16.msra.mxu1 %v3954_v5 }
 0x288   :  { %3147 = vmatprep.subr.bf16.mxu1 %v3855_v17 }
 0x335   :  { %v1016_v15 = vpop.f32.mrb[4].mxu0  ;;  %v1087_v23 = vpop.f32.mrb[10].mxu1 }
 0x336   :  { %v1092_v28 = vadd.f32 %v1016_v15, %v875_v12  ;;  %v1018_v29 = vpop.f32.mrb[5].mxu0  ;;  %v1089_v32 = vpop.f32.mrb[11].mxu1  ;;  %v3470_v42 = vadd.f32 %v1087_v23, %v4013_v55 }
 0x337   :  { %v1093_v33 = vadd.f32 %v1018_v29, %v877_v14  ;;  %v3471_v41 = vadd.f32 %v1089_v32, %v4011_v48 }
 0x338   :  { %v1096_v34 = vmul.f32 0.5, %v1092_v28  ;;  %v1098_v46 = vmul.f32 0.5, %v3470_v42 }
 0x339   :  { %v1097_v40 = vmul.f32 0.5, %v1093_v33  ;;  %v1426_v33 = vld [vmem:[#allocation4 + $0x20] sm:$0xff] }
 0x33a   :  { %3550 = vtanh.f32 %v1096_v34 }
 0x33b   :  { %3552 = vtanh.f32 %v1097_v40 }
 0x33c   :  { %3554 = vtanh.f32 %v3471_v41 }
 0x33d   :  { %3556 = vtanh.f32 %v1098_v46 }
 0x344   :  { %v3551_v47 = vpop.eup %3550 }
 0x345   :  { %v1102_v57 = vmul.f32 0.5, %v3551_v47  ;;  %v3553_v59 = vpop.eup %3552 }
 0x346   :  { %v1103_v62 = vmul.f32 0.5, %v3553_v59  ;;  %v3555_v6 = vpop.eup %3554 }
 0x347   :  { %v1105_v63 = vadd.f32 0.5, %v1102_v57  ;;  %v3557_v14 = vpop.eup %3556 }
 0x348   :  { %v1106_v16 = vadd.f32 0.5, %v1103_v62  ;;  %v1104_v15 = vmul.f32 0.5, %v3557_v14 }
 0x349   :  { %v1110_v7 = vmul.f32 %v3555_v6, %v1105_v63 }
 0x34a   :  { %v1109_v11 = vmul.f32 %v1106_v16, %v4067_v56  ;;  %v1107_v28 = vadd.f32 0.5, %v1104_v15  ;;  %v1185_v56 = vpop.f32.mrb[12].mxu1 }
 0x34b   :  { %v1187_v32 = vpop.f32.mrb[13].mxu1  ;;  %v1186_v34 = vadd.f32 %v1185_v56, %v4005_v24 }
 0x34c   :  { %v4117_v12 = vadd.f32 %v1110_v7, %v1109_v11  ;;  %v1188_v40 = vadd.f32 %v1187_v32, %v4007_v25 }
 0x34e   :  { %3558 = vtanh.f32 %v4117_v12 }
 0x358   :  { %v3559_v23 = vpop.eup %3558 }
 0x359   :  { %v1113_v29 = vmul.f32 %v3559_v23, %v1107_v28 }
 0x35b   :  { %1326 = vmatmul.mubr.f32.vlgmr.msra.gmra.mrb[6].mxu0 %v1113_v29  ;;  %1397 = vmatmul.mubr.f32.vlgmr.msra.gmra.mrb[14].mxu1 %v1113_v29 }
 0x35c   :  { %3145 = vmatpush1.bf16.msra.mxu0 %v3848_v9  ;;  %3149 = vmatpush1.bf16.msra.mxu1 %v3860_v22 }
 0x35d   :  { %1494 = vmatprep.mubr.f32.mxu0 %v3736_v0  ;;  %1565 = vmatprep.mubr.f32.mxu1 %v3736_v0 }
 0x35e   :  { %3151 = vmatprep.subr.bf16.mxu0 %v3846_v8  ;;  %3183 = vmatprep.subr.bf16.mxu1 %v3869_v31 }
 0x35f   :  { %2793 = vmatmul.mubr.msk.f32.vlgmr.msra.gmra.mrb[8].mxu0 %vm182_vm0, %v1426_v33  ;;  %2794 = vmatmul.mubr.msk.f32.vlgmr.msra.gmra.mrb[16].mxu1 %vm182_vm0, %v1426_v33 }
 0x360   :  { %3153 = vmatpush1.bf16.msra.mxu0 %v3851_v13  ;;  %3185 = vmatpush1.bf16.msra.mxu1 %v3877_v39 }
 0x361   :  { %3155 = vmatprep.subr.bf16.mxu0 %v3858_v21  ;;  %3187 = vmatprep.subr.bf16.mxu1 %v3882_v44 }
 0x362   :  { %1636 = vmatprep.mubr.f32.mxu0 %v3736_v0  ;;  %1707 = vmatprep.mubr.f32.mxu1 %v3736_v0 }
 0x364   :  { %3157 = vmatpush1.bf16.msra.mxu0 %v3863_v26  ;;  %3189 = vmatpush1.bf16.msra.mxu1 %v3886_v51 }
 0x365   :  { %3159 = vmatprep.subr.bf16.mxu0 %v3867_v30  ;;  %3191 = vmatprep.subr.bf16.mxu1 %v3893_v54 }
 0x368   :  { %3161 = vmatpush1.bf16.msra.mxu0 %v3875_v38  ;;  %3193 = vmatpush1.bf16.msra.mxu1 %v3899_v1 }
 0x369   :  { %3163 = vmatprep.subr.bf16.mxu0 %v3880_v43  ;;  %3195 = vmatprep.subr.bf16.mxu1 %v3905_v3 }
 0x36c   :  { %3165 = vmatpush1.bf16.msra.mxu0 %v3891_v53  ;;  %3197 = vmatpush1.bf16.msra.mxu1 %v3911_v18 }
 0x36d   :  { %3167 = vmatprep.subr.bf16.mxu0 %v3896_v58  ;;  %3199 = vmatprep.subr.bf16.mxu1 %v3917_v20 }
 0x370   :  { %3169 = vmatpush1.bf16.msra.mxu0 %v3903_v2  ;;  %3201 = vmatpush1.bf16.msra.mxu1 %v3923_v35 }
 0x371   :  { %3171 = vmatprep.subr.bf16.mxu0 %v3908_v10  ;;  %3203 = vmatprep.subr.bf16.mxu1 %v3929_v37 }
 0x374   :  { %3173 = vmatpush1.bf16.msra.mxu0 %v3915_v19  ;;  %3205 = vmatpush1.bf16.msra.mxu1 %v3935_v49 }
 0x375   :  { %3175 = vmatprep.subr.bf16.mxu0 %v3920_v27  ;;  %3207 = vmatprep.subr.bf16.mxu1 %v3941_v52 }
 0x378   :  { %3177 = vmatpush1.bf16.msra.mxu0 %v3927_v36  ;;  %3209 = vmatpush1.bf16.msra.mxu1 %v3945_v60 }
 0x379   :  { %3179 = vmatprep.subr.bf16.mxu0 %v3932_v45  ;;  %3211 = vmatprep.subr.bf16.mxu1 %v3949_v61 }
 0x37c   :  { %3181 = vmatpush1.bf16.msra.mxu0 %v3939_v50  ;;  %3213 = vmatpush1.bf16.msra.mxu1 %v3954_v5 }
 0x37d   :  { %3215 = vmatprep.subr.bf16.mxu0 %v3844_v4  ;;  %3219 = vmatprep.subr.bf16.mxu1 %v3855_v17 }
 0x42e   :  { %v1327_v41 = vpop.f32.mrb[6].mxu0  ;;  %v1398_v42 = vpop.f32.mrb[14].mxu1 }
 0x42f   :  { %v1403_v46 = vadd.f32 %v1327_v41, %v1186_v34  ;;  %v1329_v47 = vpop.f32.mrb[7].mxu0  ;;  %v1400_v57 = vpop.f32.mrb[15].mxu1  ;;  %v3476_v16 = vadd.f32 %v1398_v42, %v4013_v55 }
 0x430   :  { %v1404_v59 = vadd.f32 %v1329_v47, %v1188_v40  ;;  %v3477_v6 = vadd.f32 %v1400_v57, %v4011_v48 }
 0x431   :  { %v1407_v63 = vmul.f32 0.5, %v1403_v46  ;;  %v1409_v7 = vmul.f32 0.5, %v3476_v16 }
 0x432   :  { %v1408_v62 = vmul.f32 0.5, %v1404_v59 }
 0x433   :  { %3560 = vtanh.f32 %v1407_v63 }
 0x434   :  { %3562 = vtanh.f32 %v1408_v62 }
 0x435   :  { %3564 = vtanh.f32 %v3477_v6 }
 0x436   :  { %3566 = vtanh.f32 %v1409_v7 }
 0x43d   :  { %v3561_v11 = vpop.eup %3560 }
 0x43e   :  { %v1413_v14 = vmul.f32 0.5, %v3561_v11  ;;  %v3563_v15 = vpop.eup %3562 }
 0x43f   :  { %v1414_v23 = vmul.f32 0.5, %v3563_v15  ;;  %v3565_v29 = vpop.eup %3564 }
 0x440   :  { %v1416_v28 = vadd.f32 0.5, %v1413_v14  ;;  %v3567_v40 = vpop.eup %3566 }
 0x441   :  { %v1417_v56 = vadd.f32 0.5, %v1414_v23  ;;  %v1415_v41 = vmul.f32 0.5, %v3567_v40 }
 0x442   :  { %v1421_v32 = vmul.f32 %v3565_v29, %v1416_v28 }
 0x443   :  { %v1420_v33 = vmul.f32 %v1417_v56, %v4117_v12  ;;  %v1418_v46 = vadd.f32 0.5, %v1415_v41  ;;  %v1737_v12 = vld [vmem:[#allocation4 + $0x28] sm:$0xff] }
 0x445   :  { %v4167_v34 = vadd.f32 %v1421_v32, %v1420_v33 }
 0x447   :  { %3568 = vtanh.f32 %v4167_v34 }
 0x451   :  { %v3569_v42 = vpop.eup %3568 }
 0x452   :  { %v1424_v47 = vmul.f32 %v3569_v42, %v1418_v46 }
 0x454   :  { %1637 = vmatmul.mubr.f32.vlgmr.msra.gmra.mrb[8].mxu0 %v1424_v47  ;;  %1708 = vmatmul.mubr.f32.vlgmr.msra.gmra.mrb[16].mxu1 %v1424_v47 }
 0x455   :  { %3217 = vmatpush1.bf16.msra.mxu0 %v3848_v9  ;;  %3221 = vmatpush1.bf16.msra.mxu1 %v3860_v22 }
 0x456   :  { %1805 = vmatprep.mubr.f32.mxu0 %v3736_v0  ;;  %1876 = vmatprep.mubr.f32.mxu1 %v3736_v0 }
 0x457   :  { %3223 = vmatprep.subr.bf16.mxu0 %v3846_v8  ;;  %3255 = vmatprep.subr.bf16.mxu1 %v3869_v31 }
 0x458   :  { %2795 = vmatmul.mubr.msk.f32.vlgmr.msra.gmra.mrb[10].mxu0 %vm182_vm0, %v1737_v12  ;;  %2796 = vmatmul.mubr.msk.f32.vlgmr.msra.gmra.mrb[18].mxu1 %vm182_vm0, %v1737_v12 }
 0x459   :  { %3225 = vmatpush1.bf16.msra.mxu0 %v3851_v13  ;;  %3257 = vmatpush1.bf16.msra.mxu1 %v3877_v39 }
 0x45a   :  { %3227 = vmatprep.subr.bf16.mxu0 %v3858_v21  ;;  %3259 = vmatprep.subr.bf16.mxu1 %v3882_v44 }
 0x45b   :  { %1947 = vmatprep.mubr.f32.mxu0 %v3736_v0  ;;  %2018 = vmatprep.mubr.f32.mxu1 %v3736_v0 }
 0x45d   :  { %3229 = vmatpush1.bf16.msra.mxu0 %v3863_v26  ;;  %3261 = vmatpush1.bf16.msra.mxu1 %v3886_v51 }
 0x45e   :  { %3231 = vmatprep.subr.bf16.mxu0 %v3867_v30  ;;  %3263 = vmatprep.subr.bf16.mxu1 %v3893_v54 }
 0x461   :  { %3233 = vmatpush1.bf16.msra.mxu0 %v3875_v38  ;;  %3265 = vmatpush1.bf16.msra.mxu1 %v3899_v1 }
 0x462   :  { %3235 = vmatprep.subr.bf16.mxu0 %v3880_v43  ;;  %3267 = vmatprep.subr.bf16.mxu1 %v3905_v3 }
 0x465   :  { %3237 = vmatpush1.bf16.msra.mxu0 %v3891_v53  ;;  %3269 = vmatpush1.bf16.msra.mxu1 %v3911_v18 }
 0x466   :  { %3239 = vmatprep.subr.bf16.mxu0 %v3896_v58  ;;  %3271 = vmatprep.subr.bf16.mxu1 %v3917_v20 }
 0x469   :  { %3241 = vmatpush1.bf16.msra.mxu0 %v3903_v2  ;;  %3273 = vmatpush1.bf16.msra.mxu1 %v3923_v35 }
 0x46a   :  { %3243 = vmatprep.subr.bf16.mxu0 %v3908_v10  ;;  %3275 = vmatprep.subr.bf16.mxu1 %v3929_v37 }
 0x46d   :  { %3245 = vmatpush1.bf16.msra.mxu0 %v3915_v19  ;;  %3277 = vmatpush1.bf16.msra.mxu1 %v3935_v49 }
 0x46e   :  { %3247 = vmatprep.subr.bf16.mxu0 %v3920_v27  ;;  %3279 = vmatprep.subr.bf16.mxu1 %v3941_v52 }
 0x471   :  { %3249 = vmatpush1.bf16.msra.mxu0 %v3927_v36  ;;  %3281 = vmatpush1.bf16.msra.mxu1 %v3945_v60 }
 0x472   :  { %3251 = vmatprep.subr.bf16.mxu0 %v3932_v45  ;;  %3283 = vmatprep.subr.bf16.mxu1 %v3949_v61 }
 0x475   :  { %3253 = vmatpush1.bf16.msra.mxu0 %v3939_v50  ;;  %3285 = vmatpush1.bf16.msra.mxu1 %v3954_v5 }
 0x476   :  { %3287 = vmatprep.subr.bf16.mxu0 %v3844_v4  ;;  %3291 = vmatprep.subr.bf16.mxu1 %v3855_v17 }
 0x527   :  { %v1638_v57 = vpop.f32.mrb[8].mxu0  ;;  %v1709_v59 = vpop.f32.mrb[16].mxu1 }
 0x528   :  { %v3478_v63 = vadd.f32 %v1638_v57, %v4005_v24  ;;  %v1640_v62 = vpop.f32.mrb[9].mxu0  ;;  %v1711_v6 = vpop.f32.mrb[17].mxu1  ;;  %v3480_v15 = vadd.f32 %v1709_v59, %v4013_v55 }
 0x529   :  { %v3479_v16 = vadd.f32 %v1640_v62, %v4007_v25  ;;  %v3481_v14 = vadd.f32 %v1711_v6, %v4011_v48 }
 0x52a   :  { %v1718_v7 = vmul.f32 0.5, %v3478_v63  ;;  %v1720_v28 = vmul.f32 0.5, %v3480_v15 }
 0x52b   :  { %v1719_v11 = vmul.f32 0.5, %v3479_v16 }
 0x52c   :  { %3570 = vtanh.f32 %v1718_v7 }
 0x52d   :  { %3572 = vtanh.f32 %v1719_v11 }
 0x52e   :  { %3574 = vtanh.f32 %v3481_v14 }
 0x52f   :  { %3576 = vtanh.f32 %v1720_v28 }
 0x536   :  { %v3571_v23 = vpop.eup %3570 }
 0x537   :  { %v1724_v29 = vmul.f32 0.5, %v3571_v23  ;;  %v3573_v56 = vpop.eup %3572 }
 0x538   :  { %v1725_v33 = vmul.f32 0.5, %v3573_v56  ;;  %v3575_v40 = vpop.eup %3574 }
 0x539   :  { %v1727_v32 = vadd.f32 0.5, %v1724_v29  ;;  %v3577_v12 = vpop.eup %3576 }
 0x53a   :  { %v1728_v41 = vadd.f32 0.5, %v1725_v33  ;;  %v1726_v57 = vmul.f32 0.5, %v3577_v12 }
 0x53b   :  { %v1732_v46 = vmul.f32 %v3575_v40, %v1727_v32 }
 0x53c   :  { %v1731_v42 = vmul.f32 %v1728_v41, %v4167_v34  ;;  %v1729_v63 = vadd.f32 0.5, %v1726_v57  ;;  %v2048_v34 = vld [vmem:[#allocation4 + $0x30] sm:$0xff] }
 0x53e   :  { %v4217_v47 = vadd.f32 %v1732_v46, %v1731_v42 }
 0x540   :  { %3578 = vtanh.f32 %v4217_v47 }
 0x54a   :  { %v3579_v59 = vpop.eup %3578 }
 0x54b   :  { %v1735_v62 = vmul.f32 %v3579_v59, %v1729_v63 }
 0x54d   :  { %1948 = vmatmul.mubr.f32.vlgmr.msra.gmra.mrb[10].mxu0 %v1735_v62  ;;  %2019 = vmatmul.mubr.f32.vlgmr.msra.gmra.mrb[18].mxu1 %v1735_v62 }
 0x54e   :  { %3289 = vmatpush1.bf16.msra.mxu0 %v3848_v9  ;;  %3293 = vmatpush1.bf16.msra.mxu1 %v3860_v22 }
 0x54f   :  { %2116 = vmatprep.mubr.f32.mxu0 %v3736_v0  ;;  %2187 = vmatprep.mubr.f32.mxu1 %v3736_v0 }
 0x550   :  { %3295 = vmatprep.subr.bf16.mxu0 %v3846_v8  ;;  %3327 = vmatprep.subr.bf16.mxu1 %v3869_v31 }
 0x551   :  { %2797 = vmatmul.mubr.msk.f32.vlgmr.msra.gmra.mrb[12].mxu0 %vm182_vm0, %v2048_v34  ;;  %2798 = vmatmul.mubr.msk.f32.vlgmr.msra.gmra.mrb[20].mxu1 %vm182_vm0, %v2048_v34 }
 0x552   :  { %3297 = vmatpush1.bf16.msra.mxu0 %v3851_v13  ;;  %3329 = vmatpush1.bf16.msra.mxu1 %v3877_v39 }
 0x553   :  { %3299 = vmatprep.subr.bf16.mxu0 %v3858_v21  ;;  %3331 = vmatprep.subr.bf16.mxu1 %v3882_v44 }
 0x554   :  { %2258 = vmatprep.mubr.f32.mxu0 %v3736_v0  ;;  %2329 = vmatprep.mubr.f32.mxu1 %v3736_v0 }
 0x556   :  { %3301 = vmatpush1.bf16.msra.mxu0 %v3863_v26  ;;  %3333 = vmatpush1.bf16.msra.mxu1 %v3886_v51 }
 0x557   :  { %3303 = vmatprep.subr.bf16.mxu0 %v3867_v30  ;;  %3335 = vmatprep.subr.bf16.mxu1 %v3893_v54 }
 0x55a   :  { %3305 = vmatpush1.bf16.msra.mxu0 %v3875_v38  ;;  %3337 = vmatpush1.bf16.msra.mxu1 %v3899_v1 }
 0x55b   :  { %3307 = vmatprep.subr.bf16.mxu0 %v3880_v43  ;;  %3339 = vmatprep.subr.bf16.mxu1 %v3905_v3 }
 0x55e   :  { %3309 = vmatpush1.bf16.msra.mxu0 %v3891_v53  ;;  %3341 = vmatpush1.bf16.msra.mxu1 %v3911_v18 }
 0x55f   :  { %3311 = vmatprep.subr.bf16.mxu0 %v3896_v58  ;;  %3343 = vmatprep.subr.bf16.mxu1 %v3917_v20 }
 0x562   :  { %3313 = vmatpush1.bf16.msra.mxu0 %v3903_v2  ;;  %3345 = vmatpush1.bf16.msra.mxu1 %v3923_v35 }
 0x563   :  { %3315 = vmatprep.subr.bf16.mxu0 %v3908_v10  ;;  %3347 = vmatprep.subr.bf16.mxu1 %v3929_v37 }
 0x566   :  { %3317 = vmatpush1.bf16.msra.mxu0 %v3915_v19  ;;  %3349 = vmatpush1.bf16.msra.mxu1 %v3935_v49 }
 0x567   :  { %3319 = vmatprep.subr.bf16.mxu0 %v3920_v27  ;;  %3351 = vmatprep.subr.bf16.mxu1 %v3941_v52 }
 0x56a   :  { %3321 = vmatpush1.bf16.msra.mxu0 %v3927_v36  ;;  %3353 = vmatpush1.bf16.msra.mxu1 %v3945_v60 }
 0x56b   :  { %3323 = vmatprep.subr.bf16.mxu0 %v3932_v45  ;;  %3355 = vmatprep.subr.bf16.mxu1 %v3949_v61 }
 0x56e   :  { %3325 = vmatpush1.bf16.msra.mxu0 %v3939_v50  ;;  %3357 = vmatpush1.bf16.msra.mxu1 %v3954_v5 }
 0x56f   :  { %3359 = vmatprep.subr.bf16.mxu0 %v3844_v4  ;;  %3363 = vmatprep.subr.bf16.mxu1 %v3855_v17 }
 0x620   :  { %v1949_v6 = vpop.f32.mrb[10].mxu0  ;;  %v2020_v16 = vpop.f32.mrb[18].mxu1 }
 0x621   :  { %v3482_v7 = vadd.f32 %v1949_v6, %v4005_v24  ;;  %v1951_v11 = vpop.f32.mrb[11].mxu0  ;;  %v2022_v14 = vpop.f32.mrb[19].mxu1  ;;  %v3484_v56 = vadd.f32 %v2020_v16, %v4013_v55 }
 0x622   :  { %v3483_v15 = vadd.f32 %v1951_v11, %v4007_v25  ;;  %v3485_v29 = vadd.f32 %v2022_v14, %v4011_v48  ;;  %v2680_v14 = vld [vmem:[#allocation10 + $0x30] sm:$0xff] }
 0x623   :  { %v2029_v28 = vmul.f32 0.5, %v3482_v7  ;;  %v2031_v4 = vmul.f32 0.5, %v3484_v56  ;;  %v2679_v7 = vld [vmem:[#allocation10 + $0x28] sm:$0xff] }
 0x624   :  { %v2030_v23 = vmul.f32 0.5, %v3483_v15  ;;  %v2681_v15 = vld [vmem:[#allocation10 + $0x38] sm:$0xff] }
 0x625   :  { %3580 = vtanh.f32 %v2029_v28  ;;  %v3440_v28 = vpack.c.bf16 %v2681_v15, %v2680_v14 }
 0x626   :  { %3582 = vtanh.f32 %v2030_v23  ;;  %v2682_v23 = vld [vmem:[#allocation10 + $0x40] sm:$0xff] }
 0x627   :  { %3584 = vtanh.f32 %v3485_v29  ;;  %v2683_v29 = vld [vmem:[#allocation10 + $0x48] sm:$0xff] }
 0x628   :  { %3586 = vtanh.f32 %v2031_v4  ;;  %v3443_v56 = vpack.c.bf16 %v2683_v29, %v2682_v23  ;;  %v2684_v4 = vld [vmem:[#allocation10 + $0x50] sm:$0xff] }
 0x62f   :  { %v3581_v32 = vpop.eup %3580 }
 0x630   :  { %v2035_v17 = vmul.f32 0.5, %v3581_v32  ;;  %v3583_v33 = vpop.eup %3582  ;;  %v2685_v32 = vld [vmem:[#allocation10 + $0x58] sm:$0xff] }
 0x631   :  { %v2036_v41 = vmul.f32 0.5, %v3583_v33  ;;  %v3585_v46 = vpop.eup %3584  ;;  %v2686_v33 = vld [vmem:[#allocation10 + $0x60] sm:$0xff] }
 0x632   :  { %v2038_v40 = vadd.f32 0.5, %v2035_v17  ;;  %v3587_v59 = vpop.eup %3586  ;;  %v3446_v17 = vpack.c.bf16 %v2685_v32, %v2684_v4 }
 0x633   :  { %v2039_v42 = vadd.f32 0.5, %v2036_v41  ;;  %v2037_v62 = vmul.f32 0.5, %v3587_v59 }
 0x634   :  { %v2043_v12 = vmul.f32 %v3585_v46, %v2038_v40  ;;  %v2687_v40 = vld [vmem:[#allocation10 + $0x68] sm:$0xff]  ;;  %v2688_v46 = vld [vmem:[#allocation10 + $0x70] sm:$0xff] }
 0x635   :  { %v2042_v57 = vmul.f32 %v2039_v42, %v4217_v47  ;;  %v2040_v34 = vadd.f32 0.5, %v2037_v62  ;;  %v2359_v47 = vld [vmem:[#allocation4 + $0x38] sm:$0xff]  ;;  %v3449_v41 = vpack.c.bf16 %v2687_v40, %v2686_v33 }
 0x636   :  { %v2689_v42 = vld [vmem:[#allocation10 + $0x78] sm:$0xff] }
 0x637   :  { %v4267_v63 = vadd.f32 %v2043_v12, %v2042_v57  ;;  %v3452_v12 = vpack.c.bf16 %v2689_v42, %v2688_v46 }
 0x639   :  { %3588 = vtanh.f32 %v4267_v63 }
 0x643   :  { %v3589_v6 = vpop.eup %3588 }
 0x644   :  { %v2046_v16 = vmul.f32 %v3589_v6, %v2040_v34 }
 0x646   :  { %2259 = vmatmul.mubr.f32.vlgmr.msra.gmra.mrb[12].mxu0 %v2046_v16  ;;  %2330 = vmatmul.mubr.f32.vlgmr.msra.gmra.mrb[20].mxu1 %v2046_v16 }
 0x647   :  { %3361 = vmatpush1.bf16.msra.mxu0 %v3848_v9  ;;  %3365 = vmatpush1.bf16.msra.mxu1 %v3860_v22 }
 0x648   :  { %2427 = vmatprep.mubr.f32.mxu0 %v3736_v0  ;;  %2498 = vmatprep.mubr.f32.mxu1 %v3736_v0 }
 0x649   :  { %3367 = vmatprep.subr.bf16.mxu0 %v3846_v8  ;;  %3399 = vmatprep.subr.bf16.mxu1 %v3869_v31 }
 0x64a   :  { %2799 = vmatmul.mubr.msk.f32.vlgmr.msra.gmra.mrb[14].mxu0 %vm182_vm0, %v2359_v47  ;;  %2800 = vmatmul.mubr.msk.f32.vlgmr.msra.gmra.mrb[22].mxu1 %vm182_vm0, %v2359_v47 }
 0x64b   :  { %3369 = vmatpush1.bf16.msra.mxu0 %v3851_v13  ;;  %3401 = vmatpush1.bf16.msra.mxu1 %v3877_v39 }
 0x64c   :  { %3371 = vmatprep.subr.bf16.mxu0 %v3858_v21  ;;  %3403 = vmatprep.subr.bf16.mxu1 %v3882_v44 }
 0x64d   :  { %2569 = vmatprep.mubr.f32.mxu0 %v3736_v0  ;;  %2640 = vmatprep.mubr.f32.mxu1 %v3736_v0 }
 0x64f   :  { %3373 = vmatpush1.bf16.msra.mxu0 %v3863_v26  ;;  %3405 = vmatpush1.bf16.msra.mxu1 %v3886_v51 }
 0x650   :  { %3375 = vmatprep.subr.bf16.mxu0 %v3867_v30  ;;  %3407 = vmatprep.subr.bf16.mxu1 %v3893_v54 }
 0x653   :  { %3377 = vmatpush1.bf16.msra.mxu0 %v3875_v38  ;;  %3409 = vmatpush1.bf16.msra.mxu1 %v3899_v1 }
 0x654   :  { %3379 = vmatprep.subr.bf16.mxu0 %v3880_v43  ;;  %3411 = vmatprep.subr.bf16.mxu1 %v3905_v3 }
 0x657   :  { %3381 = vmatpush1.bf16.msra.mxu0 %v3891_v53  ;;  %3413 = vmatpush1.bf16.msra.mxu1 %v3911_v18 }
 0x658   :  { %3383 = vmatprep.subr.bf16.mxu0 %v3896_v58  ;;  %3415 = vmatprep.subr.bf16.mxu1 %v3917_v20 }
 0x65b   :  { %3385 = vmatpush1.bf16.msra.mxu0 %v3903_v2  ;;  %3417 = vmatpush1.bf16.msra.mxu1 %v3923_v35 }
 0x65c   :  { %3387 = vmatprep.subr.bf16.mxu0 %v3908_v10  ;;  %3419 = vmatprep.subr.bf16.mxu1 %v3929_v37  ;;  %v2674_v37 = vld [vmem:[#allocation10] sm:$0xff] }
 0x65f   :  { %3389 = vmatpush1.bf16.msra.mxu0 %v3915_v19  ;;  %3421 = vmatpush1.bf16.msra.mxu1 %v3935_v49 }
 0x660   :  { %3391 = vmatprep.subr.bf16.mxu0 %v3920_v27  ;;  %3423 = vmatprep.subr.bf16.mxu1 %v3941_v52  ;;  %v2676_v52 = vld [vmem:[#allocation10 + $0x10] sm:$0xff] }
 0x663   :  { %3393 = vmatpush1.bf16.msra.mxu0 %v3927_v36  ;;  %3425 = vmatpush1.bf16.msra.mxu1 %v3945_v60  ;;  %v2677_v60 = vld [vmem:[#allocation10 + $0x18] sm:$0xff] }
 0x664   :  { %3395 = vmatprep.subr.bf16.mxu0 %v3932_v45  ;;  %3427 = vmatprep.subr.bf16.mxu1 %v3949_v61  ;;  %v2675_v45 = vld [vmem:[#allocation10 + $0x8] sm:$0xff]  ;;  %v3434_v61 = vpack.c.bf16 %v2677_v60, %v2676_v52 }
 0x665   :  { %v3431_v49 = vpack.c.bf16 %v2675_v45, %v2674_v37 }
 0x667   :  { %3397 = vmatpush1.bf16.msra.mxu0 %v3939_v50  ;;  %3429 = vmatpush1.bf16.msra.mxu1 %v3954_v5  ;;  %v3737_v50 = vmov 0.0|0.0   ;;  %v2678_v5 = vld [vmem:[#allocation10 + $0x20] sm:$0xff] }
 0x668   :  { %3430 = vmatprep.subr.bf16.mxu0 %v3737_v50  ;;  %v3437_v11 = vpack.c.bf16 %v2679_v7, %v2678_v5 }
 0x719   :  { %v2260_v8 = vpop.f32.mrb[12].mxu0  ;;  %v2331_v9 = vpop.f32.mrb[20].mxu1 }
 0x71a   :  { %v3486_v13 = vadd.f32 %v2260_v8, %v4005_v24  ;;  %v2262_v21 = vpop.f32.mrb[13].mxu0  ;;  %v2333_v22 = vpop.f32.mrb[21].mxu1  ;;  %v3488_v39 = vadd.f32 %v2331_v9, %v4013_v55 }
 0x71b   :  { %v3487_v26 = vadd.f32 %v2262_v21, %v4007_v25  ;;  %v3489_v38 = vadd.f32 %v2333_v22, %v4011_v48 }
 0x71c   :  { %v2340_v30 = vmul.f32 0.5, %v3486_v13  ;;  %v2342_v43 = vmul.f32 0.5, %v3488_v39 }
 0x71d   :  { %v2341_v31 = vmul.f32 0.5, %v3487_v26 }
 0x71e   :  { %3590 = vtanh.f32 %v2340_v30 }
 0x71f   :  { %3592 = vtanh.f32 %v2341_v31 }
 0x720   :  { %3594 = vtanh.f32 %v3489_v38 }
 0x721   :  { %3596 = vtanh.f32 %v2342_v43 }
 0x728   :  { %v3591_v44 = vpop.eup %3590 }
 0x729   :  { %v2346_v51 = vmul.f32 0.5, %v3591_v44  ;;  %v3593_v53 = vpop.eup %3592 }
 0x72a   :  { %v2347_v58 = vmul.f32 0.5, %v3593_v53  ;;  %v3595_v1 = vpop.eup %3594 }
 0x72b   :  { %v2349_v54 = vadd.f32 0.5, %v2346_v51  ;;  %v3597_v19 = vpop.eup %3596 }
 0x72c   :  { %v2350_v2 = vadd.f32 0.5, %v2347_v58  ;;  %v2348_v20 = vmul.f32 0.5, %v3597_v19 }
 0x72d   :  { %v2354_v3 = vmul.f32 %v3595_v1, %v2349_v54 }
 0x72e   :  { %v2353_v10 = vmul.f32 %v2350_v2, %v4267_v63  ;;  %v2351_v27 = vadd.f32 0.5, %v2348_v20 }
 0x730   :  { %v4315_v18 = vadd.f32 %v2354_v3, %v2353_v10 }
 0x732   :  { %3598 = vtanh.f32 %v4315_v18 }
 0x73c   :  { %v3599_v35 = vpop.eup %3598 }
 0x73d   :  { %v2357_v36 = vmul.f32 %v3599_v35, %v2351_v27 }
 0x73f   :  { %2570 = vmatmul.mubr.f32.vlgmr.msra.gmra.mrb[14].mxu0 %v2357_v36  ;;  %2641 = vmatmul.mubr.f32.vlgmr.msra.gmra.mrb[22].mxu1 %v2357_v36 }
 0x740   :  { %3432 = vmatpush3.bf16.msra.mxu0 %v3431_v49  ;;  %2851 = vmatprep.mubr.msk.f32.mxu0 %vm3738_vm1, %v3736_v0 }
 0x741   :  { %3433 = vmatprep.subr.bf16.mxu0 %v3737_v50 }
 0x744   :  { %3435 = vmatpush3.bf16.msra.mxu0 %v3434_v61 }
 0x745   :  { %3436 = vmatprep.subr.bf16.mxu0 %v3737_v50 }
 0x748   :  { %3438 = vmatpush3.bf16.msra.mxu0 %v3437_v11 }
 0x749   :  { %3439 = vmatprep.subr.bf16.mxu0 %v3737_v50 }
 0x74c   :  { %3441 = vmatpush3.bf16.msra.mxu0 %v3440_v28 }
 0x74d   :  { %3442 = vmatprep.subr.bf16.mxu0 %v3737_v50 }
 0x750   :  { %3444 = vmatpush3.bf16.msra.mxu0 %v3443_v56 }
 0x751   :  { %3445 = vmatprep.subr.bf16.mxu0 %v3737_v50 }
 0x754   :  { %3447 = vmatpush3.bf16.msra.mxu0 %v3446_v17 }
 0x755   :  { %3448 = vmatprep.subr.bf16.mxu0 %v3737_v50 }
 0x758   :  { %3450 = vmatpush3.bf16.msra.mxu0 %v3449_v41 }
 0x759   :  { %3451 = vmatprep.subr.bf16.mxu0 %v3737_v50 }
 0x75c   :  { %3453 = vmatpush3.bf16.msra.mxu0 %v3452_v12 }
 0x812   :  { %v2571_v57 = vpop.f32.mrb[14].mxu0  ;;  %v2642_v63 = vpop.f32.mrb[22].mxu1 }
 0x813   :  { %v3490_v59 = vadd.f32 %v2571_v57, %v4005_v24  ;;  %v2573_v62 = vpop.f32.mrb[15].mxu0  ;;  %v2644_v34 = vpop.f32.mrb[23].mxu1  ;;  %v3492_v8 = vadd.f32 %v2642_v63, %v4013_v55  ;;  %v2801_v55 = vld [vmem:[%s4344_s5] ss:$0 sm:$0xff] }
 0x814   :  { %v3491_v6 = vadd.f32 %v2573_v62, %v4007_v25  ;;  %v3493_v0 = vadd.f32 %v2644_v34, %v4011_v48 }
 0x815   :  { %v2651_v16 = vmul.f32 0.5, %v3490_v59  ;;  %v2653_v9 = vmul.f32 0.5, %v3492_v8 }
 0x816   :  { %v2652_v47 = vmul.f32 0.5, %v3491_v6 }
 0x817   :  { %3600 = vtanh.f32 %v2651_v16 }
 0x818   :  { %3602 = vtanh.f32 %v2652_v47 }
 0x819   :  { %3604 = vtanh.f32 %v3493_v0 }
 0x81a   :  { %3606 = vtanh.f32 %v2653_v9 }
 0x821   :  { %v3601_v13 = vpop.eup %3600 }
 0x822   :  { %v2657_v21 = vmul.f32 0.5, %v3601_v13  ;;  %v3603_v22 = vpop.eup %3602 }
 0x823   :  { %v2658_v24 = vmul.f32 0.5, %v3603_v22  ;;  %v3605_v30 = vpop.eup %3604 }
 0x824   :  { %v2660_v26 = vadd.f32 0.5, %v2657_v21  ;;  %v3607_v43 = vpop.eup %3606 }
 0x825   :  { %v2661_v31 = vadd.f32 0.5, %v2658_v24  ;;  %v2659_v48 = vmul.f32 0.5, %v3607_v43 }
 0x826   :  { %v2665_v38 = vmul.f32 %v3605_v30, %v2660_v26 }
 0x827   :  { %v2664_v25 = vmul.f32 %v2661_v31, %v4315_v18  ;;  %v2662_v44 = vadd.f32 0.5, %v2659_v48 }
 0x829   :  { %v2666_v39 = vadd.f32 %v2665_v38, %v2664_v25 }
 0x82b   :  { %3608 = vtanh.f32 %v2666_v39 }
 0x835   :  { %v3609_v51 = vpop.eup %3608 }
 0x836   :  { %v2668_v53 = vmul.f32 %v3609_v51, %v2662_v44 }
 0x838   :  { %2852 = vmatmul.mubr.f32.vlgmr.msra.gmra.mrb[16].mxu0 %v2668_v53 }
 0x90b   :  { %v2763_v54 = vpop.f32.mrb[16].mxu0 }
 0x90c   :  { %v2764_v58 = vadd.f32 %v2801_v55, %v2763_v54  ;;  %v2853_v1 = vpop.f32.mrb[17].mxu0 }
 0x90e   :  { %2767 = vst [vmem:[#allocation12] sm:$0xff] %v2764_v58 }
 0x90f   :  { %3709 = shalt.err (!%p3706_p8)
}
 0x910   :  { %s3710_s28 = scalar_lea.hbm %s4345_s6, 128 }
 0x911   :  { %p3711_p9 = scmp.ne.s32.totalorder %s4345_s6, %s3710_s28  ;;  %p3714_p10 = scmp.lt.u32.totalorder %s3710_s28, %s4345_s6 }
 0x913   :  { %p3716_p11 = pnand %p3714_p10, %p3711_p9 }
 0x915   :  { %3719 = shalt.err (!%p3716_p11)
}
 0x916   :  { %2777 = dma.vmem_to_hbm [thread:$0]  %s2775_s24, 128, %s4345_s6, [#allocation6]  }
 0x917   :  { %3726 = dma.done.wait [#allocation6], 128  }
 0x918   :  { %3727 = vsyncadd [#allocation6], 4294967168 }
 0x919   :  { %2781 = vsyncpa [#allocation5], 1 }
 0x91a   :  { %2782 = vsyncpa [#allocation8], 1 }
 0x91b   :  { %2783 = vsyncpa [#allocation11], 1 }
 0x91c   :  { %2784 = vsyncpa [#allocation6], 1 }

</bundles_post_ra>
